<compile_context>
chip_gen: v7x
topology: tpu7x:2x2x1
jax: 0.10.0
libtpu: 0.0.40
codegen_flags: <defaults>
</compile_context>

<pallas_src>
import functools

import jax
import jax.numpy as jnp
from jax import lax
from jax.experimental import pallas as pl
from jax.experimental.pallas import tpu as pltpu

_VMEM_LIMIT = 32 * 1024 * 1024  # usage is tiny at these shapes; <= default on v6e/v7x


def _round_up(x, m):
    return ((x + m - 1) // m) * m


# ----------------------------------------------------------------------------
# Generic "tap conv" kernel: out[oy, :] = sum_taps xpad[oy+dy, dx:dx+Wo, :] @ W_tap
# The padded feature map for one batch element is resident in VMEM; every tap is a
# (Wo, Cin) x (Cin, Coutp) MXU matmul with f32 accumulation.  Optional fused bias,
# ReLU-on-input and ReLU-on-output epilogues.  Grid is over the batch ("parallel").
# ----------------------------------------------------------------------------
def _tapconv_kernel(kh, kw, Ho, Wo, act_in, act_out, has_bias, *refs):
    if has_bias:
        x_ref, w_ref, b_ref, o_ref = refs
    else:
        x_ref, w_ref, o_ref = refs

    accs = [None] * Ho
    for dy in range(kh):
        for dx in range(kw):
            w_t = w_ref[dy * kw + dx]                           # (Cin, Coutp) bf16
            for oy in range(Ho):
                xr = x_ref[0, oy + dy, pl.ds(dx, Wo), :]        # (Wo, Cin) bf16
                if act_in:
                    xr = jnp.maximum(xr, 0)
                part = jnp.dot(xr, w_t, preferred_element_type=jnp.float32)
                accs[oy] = part if accs[oy] is None else accs[oy] + part

    for oy in range(Ho):
        acc = accs[oy]
        if has_bias:
            acc = acc + b_ref[...]
        if act_out:
            acc = jnp.maximum(acc, 0.0)
        o_ref[0, oy] = acc.astype(o_ref.dtype)


def tap_conv(xp, w9, bias, kh, kw, act_in=False, act_out=False,
             out_dtype=jnp.bfloat16):
    """xp: (N, Hp, Wp, Cin) spatially pre-padded; w9: (kh*kw, Cin, Coutp) with Coutp a
    multiple of 128 (zero-padded); bias: (1, Coutp) f32 or None."""
    N, Hp, Wp, Cin = xp.shape
    Ho, Wo = Hp - kh + 1, Wp - kw + 1
    T, _, Coutp = w9.shape

    xp = xp.astype(jnp.bfloat16)
    w9 = w9.astype(jnp.bfloat16)
    args = [xp, w9]
    in_specs = [
        pl.BlockSpec((1, Hp, Wp, Cin), lambda n: (n, 0, 0, 0)),
        pl.BlockSpec((T, Cin, Coutp), lambda n: (0, 0, 0)),
    ]
    has_bias = bias is not None
    if has_bias:
        args.append(bias.astype(jnp.float32))
        in_specs.append(pl.BlockSpec((1, Coutp), lambda n: (0, 0)))

    return pl.pallas_call(
        functools.partial(_tapconv_kernel, kh, kw, Ho, Wo, act_in, act_out,
                          has_bias),
        out_shape=jax.ShapeDtypeStruct((N, Ho, Wo, Coutp), out_dtype),
        grid=(N,),
        in_specs=in_specs,
        out_specs=pl.BlockSpec((1, Ho, Wo, Coutp), lambda n: (n, 0, 0, 0)),
        compiler_params=pltpu.CompilerParams(
            dimension_semantics=("parallel",),
            vmem_limit_bytes=_VMEM_LIMIT),
    )(*args)


# ----------------------------------------------------------------------------
# Conv layer wrappers (PyTorch weight layouts), all lowered onto the tap-conv kernel
# ----------------------------------------------------------------------------
def conv3x3(x, W, b, act_in=False, act_out=False, out_dtype=jnp.bfloat16,
            cin_pad_to=None):
    """Conv2d(k=3, s=1, p=1). x: NHWC; W: (Cout, Cin, 3, 3)."""
    Cout, Cin = W.shape[:2]
    w9 = jnp.stack([jnp.transpose(W[:, :, dy, dx])
                    for dy in range(3) for dx in range(3)], axis=0)   # (9, Cin, Cout)
    if cin_pad_to is not None and cin_pad_to > Cin:
        w9 = jnp.pad(w9, ((0, 0), (0, cin_pad_to - Cin), (0, 0)))
    Coutp = _round_up(Cout, 128)
    if Coutp != Cout:
        w9 = jnp.pad(w9, ((0, 0), (0, 0), (0, Coutp - Cout)))
    bias = None
    if b is not None:
        bias = jnp.pad(b.astype(jnp.float32), (0, Coutp - Cout)).reshape(1, Coutp)
    xp = jnp.pad(x.astype(jnp.bfloat16), ((0, 0), (1, 1), (1, 1), (0, 0)))
    return tap_conv(xp, w9, bias, 3, 3, act_in=act_in, act_out=act_out,
                    out_dtype=out_dtype)


def conv1x1(x, W, b, act_in=False, act_out=False, out_dtype=jnp.bfloat16):
    """Conv2d(k=1, s=1). x: NHWC; W: (Cout, Cin, 1, 1)."""
    Cout, Cin = W.shape[:2]
    w1 = jnp.transpose(W[:, :, 0, 0]).reshape(1, Cin, Cout)
    Coutp = _round_up(Cout, 128)
    if Coutp != Cout:
        w1 = jnp.pad(w1, ((0, 0), (0, 0), (0, Coutp - Cout)))
    bias = None
    if b is not None:
        bias = jnp.pad(b.astype(jnp.float32), (0, Coutp - Cout)).reshape(1, Coutp)
    return tap_conv(x, w1, bias, 1, 1, act_in=act_in, act_out=act_out,
                    out_dtype=out_dtype)


def conv4x4_s2(x, W, b, act_in=False, act_out=False, out_dtype=jnp.bfloat16):
    """Conv2d(k=4, s=2, p=1) == 3x3/s1 tap conv on the space-to-depth (phase) tensor.
    x: NHWC (H, W even); W: (Cout, Cin, 4, 4)."""
    N, H, Wd, Cin = x.shape
    Cout = W.shape[0]
    # space-to-depth: channel order (qy, qx, cin)
    xs = x.astype(jnp.bfloat16).reshape(N, H // 2, 2, Wd // 2, 2, Cin)
    xs = jnp.transpose(xs, (0, 1, 3, 2, 4, 5)).reshape(N, H // 2, Wd // 2, 4 * Cin)
    xp = jnp.pad(xs, ((0, 0), (1, 1), (1, 1), (0, 0)))

    blocks = []
    for ry in range(3):
        for rx in range(3):
            cols = []
            for qy in range(2):
                for qx in range(2):
                    ky, kx = 2 * ry + qy - 1, 2 * rx + qx - 1
                    if 0 <= ky < 4 and 0 <= kx < 4:
                        cols.append(jnp.transpose(W[:, :, ky, kx]))   # (Cin, Cout)
                    else:
                        cols.append(jnp.zeros((Cin, Cout), W.dtype))
            blocks.append(jnp.concatenate(cols, axis=0))              # (4*Cin, Cout)
    w9 = jnp.stack(blocks, axis=0)                                    # (9, 4*Cin, Cout)

    Coutp = _round_up(Cout, 128)
    if Coutp != Cout:
        w9 = jnp.pad(w9, ((0, 0), (0, 0), (0, Coutp - Cout)))
    bias = None
    if b is not None:
        bias = jnp.pad(b.astype(jnp.float32), (0, Coutp - Cout)).reshape(1, Coutp)
    return tap_conv(xp, w9, bias, 3, 3, act_in=act_in, act_out=act_out,
                    out_dtype=out_dtype)


def conv_transpose4x4_s2(x, Wt, b, act_in=False, out_dtype=jnp.bfloat16):
    """ConvTranspose2d(k=4, s=2, p=1) == 3x3/s1 tap conv over one padded copy of x,
    producing 4*Cout phase-packed channels (phase order (py, px, cout)).
    x: NHWC; Wt: (Cin, Cout, 4, 4) PyTorch ConvTranspose2d layout."""
    N, H, Wd, Cin = x.shape
    Cout = Wt.shape[1]
    xp = jnp.pad(x.astype(jnp.bfloat16), ((0, 0), (1, 1), (1, 1), (0, 0)))

    blocks = []
    for ry in range(3):
        for rx in range(3):
            cols = []
            for py in range(2):
                for px in range(2):
                    ky, kx = 3 + py - 2 * ry, 3 + px - 2 * rx
                    if 0 <= ky < 4 and 0 <= kx < 4:
                        cols.append(Wt[:, :, ky, kx])                 # (Cin, Cout)
                    else:
                        cols.append(jnp.zeros((Cin, Cout), Wt.dtype))
            blocks.append(jnp.concatenate(cols, axis=1))              # (Cin, 4*Cout)
    w9 = jnp.stack(blocks, axis=0)                                    # (9, Cin, 4*Cout)

    C4 = 4 * Cout
    C4p = _round_up(C4, 128)
    if C4p != C4:
        w9 = jnp.pad(w9, ((0, 0), (0, 0), (0, C4p - C4)))
    bias = jnp.pad(jnp.tile(b.astype(jnp.float32), 4),
                   (0, C4p - C4)).reshape(1, C4p) if b is not None else None

    out = tap_conv(xp, w9, bias, 3, 3, act_in=act_in, act_out=False,
                   out_dtype=out_dtype)
    out = out[..., :C4].reshape(N, H, Wd, 2, 2, Cout)
    out = jnp.transpose(out, (0, 1, 3, 2, 4, 5)).reshape(N, 2 * H, 2 * Wd, Cout)
    return out


# ----------------------------------------------------------------------------
# Fused Residual block kernel: y = x + Conv1x1(ReLU(Conv3x3(ReLU(x))))
# (both convs bias-free; the intermediate activation never leaves VMEM)
# ----------------------------------------------------------------------------
def _resblock_kernel(Ho, Wo, x_ref, w3_ref, w1_ref, o_ref):
    accs = [None] * Ho
    for dy in range(3):
        for dx in range(3):
            w_t = w3_ref[dy * 3 + dx]                               # (C, RHp)
            for oy in range(Ho):
                xr = jnp.maximum(x_ref[0, oy + dy, pl.ds(dx, Wo), :], 0)
                part = jnp.dot(xr, w_t, preferred_element_type=jnp.float32)
                accs[oy] = part if accs[oy] is None else accs[oy] + part
    w1 = w1_ref[...]                                                # (RHp, C)
    for oy in range(Ho):
        h = jnp.maximum(accs[oy], 0.0).astype(jnp.bfloat16)         # (Wo, RHp)
        y = jnp.dot(h, w1, preferred_element_type=jnp.float32)      # (Wo, C)
        xc = x_ref[0, oy + 1, pl.ds(1, Wo), :]                      # unpadded center
        o_ref[0, oy] = (xc.astype(jnp.float32) + y).astype(o_ref.dtype)


def residual_block(x, w3, w1):
    """x: NHWC; w3: (RH, C, 3, 3); w1: (C, RH, 1, 1)  (PyTorch layouts)."""
    N, H, Wd, C = x.shape
    RH = w3.shape[0]
    RHp = _round_up(RH, 128)
    w3_9 = jnp.stack([jnp.transpose(w3[:, :, dy, dx])
                      for dy in range(3) for dx in range(3)], axis=0)  # (9, C, RH)
    w1_m = jnp.transpose(w1[:, :, 0, 0])                               # (RH, C)
    if RHp != RH:
        w3_9 = jnp.pad(w3_9, ((0, 0), (0, 0), (0, RHp - RH)))
        w1_m = jnp.pad(w1_m, ((0, RHp - RH), (0, 0)))
    xp = jnp.pad(x.astype(jnp.bfloat16), ((0, 0), (1, 1), (1, 1), (0, 0)))

    return pl.pallas_call(
        functools.partial(_resblock_kernel, H, Wd),
        out_shape=jax.ShapeDtypeStruct((N, H, Wd, C), jnp.bfloat16),
        grid=(N,),
        in_specs=[
            pl.BlockSpec((1, H + 2, Wd + 2, C), lambda n: (n, 0, 0, 0)),
            pl.BlockSpec((9, C, RHp), lambda n: (0, 0, 0)),
            pl.BlockSpec((RHp, C), lambda n: (0, 0)),
        ],
        out_specs=pl.BlockSpec((1, H, Wd, C), lambda n: (n, 0, 0, 0)),
        compiler_params=pltpu.CompilerParams(
            dimension_semantics=("parallel",),
            vmem_limit_bytes=_VMEM_LIMIT),
    )(xp, w3_9.astype(jnp.bfloat16), w1_m.astype(jnp.bfloat16))


# ----------------------------------------------------------------------------
# Pallas vector-quantizer (eval-mode VectorQuantizerEMA forward)
#   - codebook resident, M tiled ("parallel" grid: no cross-step state)
#   - bf16 MXU distance matmul (f32 acc); q = onehot @ e stays exact f32
#   - per-tile partial SSE / code counts reduced in the JAX wrapper
# ----------------------------------------------------------------------------
def _vq_kernel(n_valid, z_ref, e_ref, e2_ref, q_ref, sse_ref, cnt_ref):
    z = z_ref[...]                                           # (TM, Dp) f32
    e = e_ref[...]                                           # (K, Dp) f32
    num_codes = e.shape[0]
    tm = z.shape[0]

    # distances up to the per-row constant ||z||^2 (does not affect the argmin)
    ze = lax.dot_general(z.astype(jnp.bfloat16), e.astype(jnp.bfloat16),
                         (((1,), (1,)), ((), ())),
                         preferred_element_type=jnp.float32)  # z @ e^T, (TM, K)
    score = e2_ref[...] - 2.0 * ze

    smin = jnp.min(score, axis=1, keepdims=True)
    iota_k = lax.broadcasted_iota(jnp.int32, score.shape, 1)
    # first-occurrence argmin (matches torch.argmin tie-breaking)
    idx = jnp.min(jnp.where(score <= smin, iota_k, num_codes), axis=1,
                  keepdims=True)
    onehot = (iota_k == idx).astype(jnp.float32)              # (TM, K)

    q = jnp.dot(onehot, e, preferred_element_type=jnp.float32)  # exact codebook rows
    q_ref[...] = q

    # mask rows that are only M-padding out of the statistics
    row = pl.program_id(0) * tm + lax.broadcasted_iota(jnp.int32, (tm, 1), 0)
    valid = (row < n_valid).astype(jnp.float32)               # (TM, 1)

    diff = (q - z) * valid
    sse_ref[0] = jnp.sum(diff * diff, keepdims=True)               # (1, 1)
    cnt_ref[0] = jnp.sum(onehot * valid, axis=0, keepdims=True)    # (1, K)


def pallas_vq(z_flat, codebook, d_true, commitment_cost=0.25):
    """z_flat: (M, Dp) f32, feature-padded with zeros beyond d_true columns.
    Returns (q (M, Dp) f32, loss scalar, perplexity scalar)."""
    M, Dp = z_flat.shape
    K, D = codebook.shape
    e = codebook.astype(jnp.float32)
    if Dp != D:
        e = jnp.pad(e, ((0, 0), (0, Dp - D)))
    e2 = jnp.sum(e * e, axis=1).reshape(1, K)

    # >= 2 M-tiles when possible (both v7x TensorCores), tiles a multiple of 8
    if M <= 8:
        TM = _round_up(M, 8)
    else:
        TM = min(256, _round_up((M + 1) // 2, 8))
    Mp = _round_up(M, TM)
    z = z_flat.astype(jnp.float32)
    if Mp != M:
        z = jnp.pad(z, ((0, Mp - M), (0, 0)))
    G = Mp // TM

    q, sse, cnt = pl.pallas_call(
        functools.partial(_vq_kernel, M),
        out_shape=(
            jax.ShapeDtypeStruct((Mp, Dp), jnp.float32),
            jax.ShapeDtypeStruct((G, 1, 1), jnp.float32),
            jax.ShapeDtypeStruct((G, 1, K), jnp.float32),
        ),
        grid=(G,),
        in_specs=[
            pl.BlockSpec((TM, Dp), lambda i: (i, 0)),
            pl.BlockSpec((K, Dp), lambda i: (0, 0)),
            pl.BlockSpec((1, K), lambda i: (0, 0)),
        ],
        out_specs=(
            pl.BlockSpec((TM, Dp), lambda i: (i, 0)),
            pl.BlockSpec((1, 1, 1), lambda i: (i, 0, 0)),
            pl.BlockSpec((1, 1, K), lambda i: (i, 0, 0)),
        ),
        compiler_params=pltpu.CompilerParams(
            dimension_semantics=("parallel",),
            vmem_limit_bytes=_VMEM_LIMIT),
    )(z, e, e2)

    if Mp != M:
        q = q[:M]
    e_latent_loss = jnp.sum(sse) / (M * d_true)
    loss = commitment_cost * e_latent_loss
    avg = jnp.sum(cnt, axis=(0, 1)) / M
    perplexity = jnp.exp(-jnp.sum(avg * jnp.log(avg + 1e-10)))
    return q, loss, perplexity


# ----------------------------------------------------------------------------
# Parameters (deterministic synthetic init, shapes from VQ_VAE.__init__)
# ----------------------------------------------------------------------------
def init_params(key):
    keys = iter(jax.random.split(key, 32))
    n = lambda shape, s=0.05: s * jax.random.normal(next(keys), shape, jnp.float32)
    H, RH, D, KC = 128, 32, 64, 512   # num_hiddens, residual_hiddens, emb_dim, num_emb
    p = {}
    # Encoder
    p["e_c1_w"] = n((H // 2, 3, 4, 4));       p["e_c1_b"] = n((H // 2,))
    p["e_c2_w"] = n((H, H // 2, 4, 4));       p["e_c2_b"] = n((H,))
    p["e_c3_w"] = n((H, H, 3, 3));            p["e_c3_b"] = n((H,))
    p["e_res"] = [(n((RH, H, 3, 3)), n((H, RH, 1, 1))) for _ in range(2)]
    # pre-VQ 1x1 conv
    p["pre_w"] = n((D, H, 1, 1));             p["pre_b"] = n((D,))
    # VQ-EMA codebook (embedding.weight.data.normal_())
    p["codebook"] = jax.random.normal(next(keys), (KC, D), jnp.float32)
    # Decoder
    p["d_c1_w"] = n((H, D, 3, 3));            p["d_c1_b"] = n((H,))
    p["d_res"] = [(n((RH, H, 3, 3)), n((H, RH, 1, 1))) for _ in range(2)]
    p["d_t1_w"] = n((H, H // 2, 4, 4));       p["d_t1_b"] = n((H // 2,))
    p["d_t2_w"] = n((H // 2, 3, 4, 4));       p["d_t2_b"] = n((3,))
    return p


# ----------------------------------------------------------------------------
# VQ_VAE forward
# ----------------------------------------------------------------------------
def vqvae_forward(params, x_nchw):
    x = jnp.transpose(x_nchw, (0, 2, 3, 1)).astype(jnp.float32)   # NCHW -> NHWC

    # --- Encoder ---
    h = conv4x4_s2(x, params["e_c1_w"], params["e_c1_b"], act_out=True)
    h = h[..., :params["e_c1_w"].shape[0]]                        # true 64 channels
    h = conv4x4_s2(h, params["e_c2_w"], params["e_c2_b"], act_out=True)
    h = conv3x3(h, params["e_c3_w"], params["e_c3_b"])
    for w3, w1 in params["e_res"]:
        h = residual_block(h, w3, w1)
    # ResidualStack final ReLU fused into the pre-VQ 1x1 conv (act_in=True).
    # The pre-VQ conv keeps its lane-padded output (channels 64..127 are exactly 0),
    # which is the padded-D layout the VQ and the decoder conv_1 consume directly.
    z = conv1x1(h, params["pre_w"], params["pre_b"], act_in=True,
                out_dtype=jnp.float32)

    # --- Vector quantizer (eval forward) ---
    N, Hh, Ww, Dp = z.shape
    D = params["codebook"].shape[1]
    q_flat, loss, perplexity = pallas_vq(z.reshape(N * Hh * Ww, Dp),
                                         params["codebook"], D)
    q = q_flat.reshape(N, Hh, Ww, Dp)                             # padded channels stay 0

    # --- Decoder ---
    d = conv3x3(q, params["d_c1_w"], params["d_c1_b"], cin_pad_to=Dp)
    for w3, w1 in params["d_res"]:
        d = residual_block(d, w3, w1)
    # ResidualStack final ReLU fused into conv_trans_1 (act_in=True)
    d = conv_transpose4x4_s2(d, params["d_t1_w"], params["d_t1_b"], act_in=True)
    # ReLU after conv_trans_1 fused into conv_trans_2 (act_in=True)
    rec = conv_transpose4x4_s2(d, params["d_t2_w"], params["d_t2_b"], act_in=True,
                               out_dtype=jnp.float32)

    return loss, jnp.transpose(rec, (0, 3, 1, 2)), perplexity      # NHWC -> NCHW


# ----------------------------------------------------------------------------
# lax references used only to validate the stride-2 conv / convT index mappings
# ----------------------------------------------------------------------------
def _conv2d_ref(x, W, b, stride, pad):
    w_hwio = jnp.transpose(W, (2, 3, 1, 0)).astype(jnp.bfloat16)
    y = lax.conv_general_dilated(x.astype(jnp.bfloat16), w_hwio, (stride, stride),
                                 ((pad, pad), (pad, pad)),
                                 dimension_numbers=("NHWC", "HWIO", "NHWC"),
                                 preferred_element_type=jnp.float32)
    return y + b.astype(jnp.float32)


def _conv_transpose_ref(x, Wt, b):
    # ConvTranspose2d(k=4, s=2, p=1): lhs-dilate by 2, pad 2, flipped kernel
    w_hwio = jnp.transpose(Wt[:, :, ::-1, ::-1], (2, 3, 0, 1)).astype(jnp.bfloat16)
    y = lax.conv_general_dilated(x.astype(jnp.bfloat16), w_hwio, (1, 1),
                                 ((2, 2), (2, 2)), lhs_dilation=(2, 2),
                                 dimension_numbers=("NHWC", "HWIO", "NHWC"),
                                 preferred_element_type=jnp.float32)
    return y + b.astype(jnp.float32)


if __name__ == "__main__":
    key = jax.random.PRNGKey(0)
    pkey, xkey = jax.random.split(key)
    params = init_params(pkey)
    x = jax.random.normal(xkey, (2, 3, 16, 16), jnp.float32)      # NCHW like PyTorch

    # --- numerical validation of the conv / convT lowerings against lax ---
    vk = jax.random.split(jax.random.PRNGKey(1), 5)
    xc = jax.random.normal(vk[0], (2, 8, 8, 16), jnp.float32)
    wc = 0.1 * jax.random.normal(vk[1], (32, 16, 4, 4), jnp.float32)
    bc = 0.1 * jax.random.normal(vk[2], (32,), jnp.float32)
    got = conv4x4_s2(xc, wc, bc)[..., :32].astype(jnp.float32)
    ref = _conv2d_ref(xc, wc, bc, 2, 1)
    assert bool(jnp.allclose(got, ref, atol=3e-2, rtol=3e-2)), "conv4x4_s2 mismatch"

    wt = 0.1 * jax.random.normal(vk[3], (16, 8, 4, 4), jnp.float32)
    bt = 0.1 * jax.random.normal(vk[4], (8,), jnp.float32)
    got_t = conv_transpose4x4_s2(xc, wt, bt).astype(jnp.float32)
    ref_t = _conv_transpose_ref(xc, wt, bt)
    assert bool(jnp.allclose(got_t, ref_t, atol=3e-2, rtol=3e-2)), \
        "conv_transpose4x4_s2 mismatch"

    # --- full forward ---
    loss, rec, perplexity = jax.jit(vqvae_forward)(params, x)
    jax.block_until_ready((loss, rec, perplexity))

    assert rec.shape == (2, 3, 16, 16)
    assert loss.shape == () and perplexity.shape == ()
    assert jnp.isfinite(loss) and jnp.isfinite(perplexity)
    assert bool(jnp.all(jnp.isfinite(rec)))
    print("KERNEL_OK")
</pallas_src>

<mosaic_0001>
module attributes {stable_mosaic.version = 11 : i64} {
  func.func @_tapconv_kernel(%arg0: i32, %arg1: memref<1x6x6x64xbf16, #tpu.memory_space<vmem>>, %arg2: memref<9x64x128xbf16, #tpu.memory_space<vmem>>, %arg3: memref<1x128xf32, #tpu.memory_space<vmem>>, %arg4: memref<1x4x4x128xbf16, #tpu.memory_space<vmem>>) attributes {dimension_semantics = [#tpu.dimension_semantics<parallel>], iteration_bounds = array<i64: 2>, scalar_prefetch = 0 : i64, scratch_operands = 0 : i64, tpu.core_type = #tpu.core_type<tc>, window_params = [{transform_indices = @transform_0, window_bounds = array<i64: 1, 6, 6, 64>}, {pipeline_mode = #tpu.pipeline_mode<synchronous>, transform_indices = @transform_1, window_bounds = array<i64: 9, 64, 128>}, {pipeline_mode = #tpu.pipeline_mode<synchronous>, transform_indices = @transform_2, window_bounds = array<i64: 1, 128>}, {transform_indices = @transform_3, window_bounds = array<i64: 1, 4, 4, 128>}]} {
    %c0 = arith.constant 0 : index
    %c0_0 = arith.constant 0 : index
    %c0_1 = arith.constant 0 : index
    %0 = vector.load %arg2[%c0, %c0_0, %c0_1] : memref<9x64x128xbf16, #tpu.memory_space<vmem>>, vector<1x64x128xbf16>
    %1 = vector.shape_cast %0 : vector<1x64x128xbf16> to vector<64x128xbf16>
    %c0_2 = arith.constant 0 : index
    %c0_3 = arith.constant 0 : index
    %c0_4 = arith.constant 0 : index
    %c0_5 = arith.constant 0 : index
    %2 = vector.load %arg1[%c0_2, %c0_3, %c0_4, %c0_5] : memref<1x6x6x64xbf16, #tpu.memory_space<vmem>>, vector<1x1x4x64xbf16>
    %3 = vector.shape_cast %2 : vector<1x1x4x64xbf16> to vector<4x64xbf16>
    %cst = arith.constant dense<0.000000e+00> : vector<4x128xf32>
    %4 = tpu.matmul %3, %1, %cst {dimension_numbers = #tpu.dot_dimension_numbers<[1], [0], [0], [1], [0, 0, 1, 1], [], []>} : vector<4x64xbf16>, vector<64x128xbf16>, vector<4x128xf32> -> vector<4x128xf32>
    %c0_6 = arith.constant 0 : index
    %c1 = arith.constant 1 : index
    %c0_7 = arith.constant 0 : index
    %c0_8 = arith.constant 0 : index
    %5 = vector.load %arg1[%c0_6, %c1, %c0_7, %c0_8] : memref<1x6x6x64xbf16, #tpu.memory_space<vmem>>, vector<1x1x4x64xbf16>
    %6 = vector.shape_cast %5 : vector<1x1x4x64xbf16> to vector<4x64xbf16>
    %cst_9 = arith.constant dense<0.000000e+00> : vector<4x128xf32>
    %7 = tpu.matmul %6, %1, %cst_9 {dimension_numbers = #tpu.dot_dimension_numbers<[1], [0], [0], [1], [0, 0, 1, 1], [], []>} : vector<4x64xbf16>, vector<64x128xbf16>, vector<4x128xf32> -> vector<4x128xf32>
    %c0_10 = arith.constant 0 : index
    %c2 = arith.constant 2 : index
    %c0_11 = arith.constant 0 : index
    %c0_12 = arith.constant 0 : index
    %8 = vector.load %arg1[%c0_10, %c2, %c0_11, %c0_12] : memref<1x6x6x64xbf16, #tpu.memory_space<vmem>>, vector<1x1x4x64xbf16>
    %9 = vector.shape_cast %8 : vector<1x1x4x64xbf16> to vector<4x64xbf16>
    %cst_13 = arith.constant dense<0.000000e+00> : vector<4x128xf32>
    %10 = tpu.matmul %9, %1, %cst_13 {dimension_numbers = #tpu.dot_dimension_numbers<[1], [0], [0], [1], [0, 0, 1, 1], [], []>} : vector<4x64xbf16>, vector<64x128xbf16>, vector<4x128xf32> -> vector<4x128xf32>
    %c0_14 = arith.constant 0 : index
    %c3 = arith.constant 3 : index
    %c0_15 = arith.constant 0 : index
    %c0_16 = arith.constant 0 : index
    %11 = vector.load %arg1[%c0_14, %c3, %c0_15, %c0_16] : memref<1x6x6x64xbf16, #tpu.memory_space<vmem>>, vector<1x1x4x64xbf16>
    %12 = vector.shape_cast %11 : vector<1x1x4x64xbf16> to vector<4x64xbf16>
    %cst_17 = arith.constant dense<0.000000e+00> : vector<4x128xf32>
    %13 = tpu.matmul %12, %1, %cst_17 {dimension_numbers = #tpu.dot_dimension_numbers<[1], [0], [0], [1], [0, 0, 1, 1], [], []>} : vector<4x64xbf16>, vector<64x128xbf16>, vector<4x128xf32> -> vector<4x128xf32>
    %c1_18 = arith.constant 1 : index
    %c0_19 = arith.constant 0 : index
    %c0_20 = arith.constant 0 : index
    %14 = vector.load %arg2[%c1_18, %c0_19, %c0_20] : memref<9x64x128xbf16, #tpu.memory_space<vmem>>, vector<1x64x128xbf16>
    %15 = vector.shape_cast %14 : vector<1x64x128xbf16> to vector<64x128xbf16>
    %c0_21 = arith.constant 0 : index
    %c0_22 = arith.constant 0 : index
    %c1_23 = arith.constant 1 : index
    %c0_24 = arith.constant 0 : index
    %16 = vector.load %arg1[%c0_21, %c0_22, %c1_23, %c0_24] : memref<1x6x6x64xbf16, #tpu.memory_space<vmem>>, vector<1x1x4x64xbf16>
    %17 = vector.shape_cast %16 : vector<1x1x4x64xbf16> to vector<4x64xbf16>
    %cst_25 = arith.constant dense<0.000000e+00> : vector<4x128xf32>
    %18 = tpu.matmul %17, %15, %cst_25 {dimension_numbers = #tpu.dot_dimension_numbers<[1], [0], [0], [1], [0, 0, 1, 1], [], []>} : vector<4x64xbf16>, vector<64x128xbf16>, vector<4x128xf32> -> vector<4x128xf32>
    %19 = arith.addf %4, %18 : vector<4x128xf32>
    %c0_26 = arith.constant 0 : index
    %c1_27 = arith.constant 1 : index
    %c1_28 = arith.constant 1 : index
    %c0_29 = arith.constant 0 : index
    %20 = vector.load %arg1[%c0_26, %c1_27, %c1_28, %c0_29] : memref<1x6x6x64xbf16, #tpu.memory_space<vmem>>, vector<1x1x4x64xbf16>
    %21 = vector.shape_cast %20 : vector<1x1x4x64xbf16> to vector<4x64xbf16>
    %cst_30 = arith.constant dense<0.000000e+00> : vector<4x128xf32>
    %22 = tpu.matmul %21, %15, %cst_30 {dimension_numbers = #tpu.dot_dimension_numbers<[1], [0], [0], [1], [0, 0, 1, 1], [], []>} : vector<4x64xbf16>, vector<64x128xbf16>, vector<4x128xf32> -> vector<4x128xf32>
    %23 = arith.addf %7, %22 : vector<4x128xf32>
    %c0_31 = arith.constant 0 : index
    %c2_32 = arith.constant 2 : index
    %c1_33 = arith.constant 1 : index
    %c0_34 = arith.constant 0 : index
    %24 = vector.load %arg1[%c0_31, %c2_32, %c1_33, %c0_34] : memref<1x6x6x64xbf16, #tpu.memory_space<vmem>>, vector<1x1x4x64xbf16>
    %25 = vector.shape_cast %24 : vector<1x1x4x64xbf16> to vector<4x64xbf16>
    %cst_35 = arith.constant dense<0.000000e+00> : vector<4x128xf32>
    %26 = tpu.matmul %25, %15, %cst_35 {dimension_numbers = #tpu.dot_dimension_numbers<[1], [0], [0], [1], [0, 0, 1, 1], [], []>} : vector<4x64xbf16>, vector<64x128xbf16>, vector<4x128xf32> -> vector<4x128xf32>
    %27 = arith.addf %10, %26 : vector<4x128xf32>
    %c0_36 = arith.constant 0 : index
    %c3_37 = arith.constant 3 : index
    %c1_38 = arith.constant 1 : index
    %c0_39 = arith.constant 0 : index
    %28 = vector.load %arg1[%c0_36, %c3_37, %c1_38, %c0_39] : memref<1x6x6x64xbf16, #tpu.memory_space<vmem>>, vector<1x1x4x64xbf16>
    %29 = vector.shape_cast %28 : vector<1x1x4x64xbf16> to vector<4x64xbf16>
    %cst_40 = arith.constant dense<0.000000e+00> : vector<4x128xf32>
    %30 = tpu.matmul %29, %15, %cst_40 {dimension_numbers = #tpu.dot_dimension_numbers<[1], [0], [0], [1], [0, 0, 1, 1], [], []>} : vector<4x64xbf16>, vector<64x128xbf16>, vector<4x128xf32> -> vector<4x128xf32>
    %31 = arith.addf %13, %30 : vector<4x128xf32>
    %c2_41 = arith.constant 2 : index
    %c0_42 = arith.constant 0 : index
    %c0_43 = arith.constant 0 : index
    %32 = vector.load %arg2[%c2_41, %c0_42, %c0_43] : memref<9x64x128xbf16, #tpu.memory_space<vmem>>, vector<1x64x128xbf16>
    %33 = vector.shape_cast %32 : vector<1x64x128xbf16> to vector<64x128xbf16>
    %c0_44 = arith.constant 0 : index
    %c0_45 = arith.constant 0 : index
    %c2_46 = arith.constant 2 : index
    %c0_47 = arith.constant 0 : index
    %34 = vector.load %arg1[%c0_44, %c0_45, %c2_46, %c0_47] : memref<1x6x6x64xbf16, #tpu.memory_space<vmem>>, vector<1x1x4x64xbf16>
    %35 = vector.shape_cast %34 : vector<1x1x4x64xbf16> to vector<4x64xbf16>
    %cst_48 = arith.constant dense<0.000000e+00> : vector<4x128xf32>
    %36 = tpu.matmul %35, %33, %cst_48 {dimension_numbers = #tpu.dot_dimension_numbers<[1], [0], [0], [1], [0, 0, 1, 1], [], []>} : vector<4x64xbf16>, vector<64x128xbf16>, vector<4x128xf32> -> vector<4x128xf32>
    %37 = arith.addf %19, %36 : vector<4x128xf32>
    %c0_49 = arith.constant 0 : index
    %c1_50 = arith.constant 1 : index
    %c2_51 = arith.constant 2 : index
    %c0_52 = arith.constant 0 : index
    %38 = vector.load %arg1[%c0_49, %c1_50, %c2_51, %c0_52] : memref<1x6x6x64xbf16, #tpu.memory_space<vmem>>, vector<1x1x4x64xbf16>
    %39 = vector.shape_cast %38 : vector<1x1x4x64xbf16> to vector<4x64xbf16>
    %cst_53 = arith.constant dense<0.000000e+00> : vector<4x128xf32>
    %40 = tpu.matmul %39, %33, %cst_53 {dimension_numbers = #tpu.dot_dimension_numbers<[1], [0], [0], [1], [0, 0, 1, 1], [], []>} : vector<4x64xbf16>, vector<64x128xbf16>, vector<4x128xf32> -> vector<4x128xf32>
    %41 = arith.addf %23, %40 : vector<4x128xf32>
    %c0_54 = arith.constant 0 : index
    %c2_55 = arith.constant 2 : index
    %c2_56 = arith.constant 2 : index
    %c0_57 = arith.constant 0 : index
    %42 = vector.load %arg1[%c0_54, %c2_55, %c2_56, %c0_57] : memref<1x6x6x64xbf16, #tpu.memory_space<vmem>>, vector<1x1x4x64xbf16>
    %43 = vector.shape_cast %42 : vector<1x1x4x64xbf16> to vector<4x64xbf16>
    %cst_58 = arith.constant dense<0.000000e+00> : vector<4x128xf32>
    %44 = tpu.matmul %43, %33, %cst_58 {dimension_numbers = #tpu.dot_dimension_numbers<[1], [0], [0], [1], [0, 0, 1, 1], [], []>} : vector<4x64xbf16>, vector<64x128xbf16>, vector<4x128xf32> -> vector<4x128xf32>
    %45 = arith.addf %27, %44 : vector<4x128xf32>
    %c0_59 = arith.constant 0 : index
    %c3_60 = arith.constant 3 : index
    %c2_61 = arith.constant 2 : index
    %c0_62 = arith.constant 0 : index
    %46 = vector.load %arg1[%c0_59, %c3_60, %c2_61, %c0_62] : memref<1x6x6x64xbf16, #tpu.memory_space<vmem>>, vector<1x1x4x64xbf16>
    %47 = vector.shape_cast %46 : vector<1x1x4x64xbf16> to vector<4x64xbf16>
    %cst_63 = arith.constant dense<0.000000e+00> : vector<4x128xf32>
    %48 = tpu.matmul %47, %33, %cst_63 {dimension_numbers = #tpu.dot_dimension_numbers<[1], [0], [0], [1], [0, 0, 1, 1], [], []>} : vector<4x64xbf16>, vector<64x128xbf16>, vector<4x128xf32> -> vector<4x128xf32>
    %49 = arith.addf %31, %48 : vector<4x128xf32>
    %c3_64 = arith.constant 3 : index
    %c0_65 = arith.constant 0 : index
    %c0_66 = arith.constant 0 : index
    %50 = vector.load %arg2[%c3_64, %c0_65, %c0_66] : memref<9x64x128xbf16, #tpu.memory_space<vmem>>, vector<1x64x128xbf16>
    %51 = vector.shape_cast %50 : vector<1x64x128xbf16> to vector<64x128xbf16>
    %c0_67 = arith.constant 0 : index
    %c1_68 = arith.constant 1 : index
    %c0_69 = arith.constant 0 : index
    %c0_70 = arith.constant 0 : index
    %52 = vector.load %arg1[%c0_67, %c1_68, %c0_69, %c0_70] : memref<1x6x6x64xbf16, #tpu.memory_space<vmem>>, vector<1x1x4x64xbf16>
    %53 = vector.shape_cast %52 : vector<1x1x4x64xbf16> to vector<4x64xbf16>
    %cst_71 = arith.constant dense<0.000000e+00> : vector<4x128xf32>
    %54 = tpu.matmul %53, %51, %cst_71 {dimension_numbers = #tpu.dot_dimension_numbers<[1], [0], [0], [1], [0, 0, 1, 1], [], []>} : vector<4x64xbf16>, vector<64x128xbf16>, vector<4x128xf32> -> vector<4x128xf32>
    %55 = arith.addf %37, %54 : vector<4x128xf32>
    %c0_72 = arith.constant 0 : index
    %c2_73 = arith.constant 2 : index
    %c0_74 = arith.constant 0 : index
    %c0_75 = arith.constant 0 : index
    %56 = vector.load %arg1[%c0_72, %c2_73, %c0_74, %c0_75] : memref<1x6x6x64xbf16, #tpu.memory_space<vmem>>, vector<1x1x4x64xbf16>
    %57 = vector.shape_cast %56 : vector<1x1x4x64xbf16> to vector<4x64xbf16>
    %cst_76 = arith.constant dense<0.000000e+00> : vector<4x128xf32>
    %58 = tpu.matmul %57, %51, %cst_76 {dimension_numbers = #tpu.dot_dimension_numbers<[1], [0], [0], [1], [0, 0, 1, 1], [], []>} : vector<4x64xbf16>, vector<64x128xbf16>, vector<4x128xf32> -> vector<4x128xf32>
    %59 = arith.addf %41, %58 : vector<4x128xf32>
    %c0_77 = arith.constant 0 : index
    %c3_78 = arith.constant 3 : index
    %c0_79 = arith.constant 0 : index
    %c0_80 = arith.constant 0 : index
    %60 = vector.load %arg1[%c0_77, %c3_78, %c0_79, %c0_80] : memref<1x6x6x64xbf16, #tpu.memory_space<vmem>>, vector<1x1x4x64xbf16>
    %61 = vector.shape_cast %60 : vector<1x1x4x64xbf16> to vector<4x64xbf16>
    %cst_81 = arith.constant dense<0.000000e+00> : vector<4x128xf32>
    %62 = tpu.matmul %61, %51, %cst_81 {dimension_numbers = #tpu.dot_dimension_numbers<[1], [0], [0], [1], [0, 0, 1, 1], [], []>} : vector<4x64xbf16>, vector<64x128xbf16>, vector<4x128xf32> -> vector<4x128xf32>
    %63 = arith.addf %45, %62 : vector<4x128xf32>
    %c0_82 = arith.constant 0 : index
    %c4 = arith.constant 4 : index
    %c0_83 = arith.constant 0 : index
    %c0_84 = arith.constant 0 : index
    %64 = vector.load %arg1[%c0_82, %c4, %c0_83, %c0_84] : memref<1x6x6x64xbf16, #tpu.memory_space<vmem>>, vector<1x1x4x64xbf16>
    %65 = vector.shape_cast %64 : vector<1x1x4x64xbf16> to vector<4x64xbf16>
    %cst_85 = arith.constant dense<0.000000e+00> : vector<4x128xf32>
    %66 = tpu.matmul %65, %51, %cst_85 {dimension_numbers = #tpu.dot_dimension_numbers<[1], [0], [0], [1], [0, 0, 1, 1], [], []>} : vector<4x64xbf16>, vector<64x128xbf16>, vector<4x128xf32> -> vector<4x128xf32>
    %67 = arith.addf %49, %66 : vector<4x128xf32>
    %c4_86 = arith.constant 4 : index
    %c0_87 = arith.constant 0 : index
    %c0_88 = arith.constant 0 : index
    %68 = vector.load %arg2[%c4_86, %c0_87, %c0_88] : memref<9x64x128xbf16, #tpu.memory_space<vmem>>, vector<1x64x128xbf16>
    %69 = vector.shape_cast %68 : vector<1x64x128xbf16> to vector<64x128xbf16>
    %c0_89 = arith.constant 0 : index
    %c1_90 = arith.constant 1 : index
    %c1_91 = arith.constant 1 : index
    %c0_92 = arith.constant 0 : index
    %70 = vector.load %arg1[%c0_89, %c1_90, %c1_91, %c0_92] : memref<1x6x6x64xbf16, #tpu.memory_space<vmem>>, vector<1x1x4x64xbf16>
    %71 = vector.shape_cast %70 : vector<1x1x4x64xbf16> to vector<4x64xbf16>
    %cst_93 = arith.constant dense<0.000000e+00> : vector<4x128xf32>
    %72 = tpu.matmul %71, %69, %cst_93 {dimension_numbers = #tpu.dot_dimension_numbers<[1], [0], [0], [1], [0, 0, 1, 1], [], []>} : vector<4x64xbf16>, vector<64x128xbf16>, vector<4x128xf32> -> vector<4x128xf32>
    %73 = arith.addf %55, %72 : vector<4x128xf32>
    %c0_94 = arith.constant 0 : index
    %c2_95 = arith.constant 2 : index
    %c1_96 = arith.constant 1 : index
    %c0_97 = arith.constant 0 : index
    %74 = vector.load %arg1[%c0_94, %c2_95, %c1_96, %c0_97] : memref<1x6x6x64xbf16, #tpu.memory_space<vmem>>, vector<1x1x4x64xbf16>
    %75 = vector.shape_cast %74 : vector<1x1x4x64xbf16> to vector<4x64xbf16>
    %cst_98 = arith.constant dense<0.000000e+00> : vector<4x128xf32>
    %76 = tpu.matmul %75, %69, %cst_98 {dimension_numbers = #tpu.dot_dimension_numbers<[1], [0], [0], [1], [0, 0, 1, 1], [], []>} : vector<4x64xbf16>, vector<64x128xbf16>, vector<4x128xf32> -> vector<4x128xf32>
    %77 = arith.addf %59, %76 : vector<4x128xf32>
    %c0_99 = arith.constant 0 : index
    %c3_100 = arith.constant 3 : index
    %c1_101 = arith.constant 1 : index
    %c0_102 = arith.constant 0 : index
    %78 = vector.load %arg1[%c0_99, %c3_100, %c1_101, %c0_102] : memref<1x6x6x64xbf16, #tpu.memory_space<vmem>>, vector<1x1x4x64xbf16>
    %79 = vector.shape_cast %78 : vector<1x1x4x64xbf16> to vector<4x64xbf16>
    %cst_103 = arith.constant dense<0.000000e+00> : vector<4x128xf32>
    %80 = tpu.matmul %79, %69, %cst_103 {dimension_numbers = #tpu.dot_dimension_numbers<[1], [0], [0], [1], [0, 0, 1, 1], [], []>} : vector<4x64xbf16>, vector<64x128xbf16>, vector<4x128xf32> -> vector<4x128xf32>
    %81 = arith.addf %63, %80 : vector<4x128xf32>
    %c0_104 = arith.constant 0 : index
    %c4_105 = arith.constant 4 : index
    %c1_106 = arith.constant 1 : index
    %c0_107 = arith.constant 0 : index
    %82 = vector.load %arg1[%c0_104, %c4_105, %c1_106, %c0_107] : memref<1x6x6x64xbf16, #tpu.memory_space<vmem>>, vector<1x1x4x64xbf16>
    %83 = vector.shape_cast %82 : vector<1x1x4x64xbf16> to vector<4x64xbf16>
    %cst_108 = arith.constant dense<0.000000e+00> : vector<4x128xf32>
    %84 = tpu.matmul %83, %69, %cst_108 {dimension_numbers = #tpu.dot_dimension_numbers<[1], [0], [0], [1], [0, 0, 1, 1], [], []>} : vector<4x64xbf16>, vector<64x128xbf16>, vector<4x128xf32> -> vector<4x128xf32>
    %85 = arith.addf %67, %84 : vector<4x128xf32>
    %c5 = arith.constant 5 : index
    %c0_109 = arith.constant 0 : index
    %c0_110 = arith.constant 0 : index
    %86 = vector.load %arg2[%c5, %c0_109, %c0_110] : memref<9x64x128xbf16, #tpu.memory_space<vmem>>, vector<1x64x128xbf16>
    %87 = vector.shape_cast %86 : vector<1x64x128xbf16> to vector<64x128xbf16>
    %c0_111 = arith.constant 0 : index
    %c1_112 = arith.constant 1 : index
    %c2_113 = arith.constant 2 : index
    %c0_114 = arith.constant 0 : index
    %88 = vector.load %arg1[%c0_111, %c1_112, %c2_113, %c0_114] : memref<1x6x6x64xbf16, #tpu.memory_space<vmem>>, vector<1x1x4x64xbf16>
    %89 = vector.shape_cast %88 : vector<1x1x4x64xbf16> to vector<4x64xbf16>
    %cst_115 = arith.constant dense<0.000000e+00> : vector<4x128xf32>
    %90 = tpu.matmul %89, %87, %cst_115 {dimension_numbers = #tpu.dot_dimension_numbers<[1], [0], [0], [1], [0, 0, 1, 1], [], []>} : vector<4x64xbf16>, vector<64x128xbf16>, vector<4x128xf32> -> vector<4x128xf32>
    %91 = arith.addf %73, %90 : vector<4x128xf32>
    %c0_116 = arith.constant 0 : index
    %c2_117 = arith.constant 2 : index
    %c2_118 = arith.constant 2 : index
    %c0_119 = arith.constant 0 : index
    %92 = vector.load %arg1[%c0_116, %c2_117, %c2_118, %c0_119] : memref<1x6x6x64xbf16, #tpu.memory_space<vmem>>, vector<1x1x4x64xbf16>
    %93 = vector.shape_cast %92 : vector<1x1x4x64xbf16> to vector<4x64xbf16>
    %cst_120 = arith.constant dense<0.000000e+00> : vector<4x128xf32>
    %94 = tpu.matmul %93, %87, %cst_120 {dimension_numbers = #tpu.dot_dimension_numbers<[1], [0], [0], [1], [0, 0, 1, 1], [], []>} : vector<4x64xbf16>, vector<64x128xbf16>, vector<4x128xf32> -> vector<4x128xf32>
    %95 = arith.addf %77, %94 : vector<4x128xf32>
    %c0_121 = arith.constant 0 : index
    %c3_122 = arith.constant 3 : index
    %c2_123 = arith.constant 2 : index
    %c0_124 = arith.constant 0 : index
    %96 = vector.load %arg1[%c0_121, %c3_122, %c2_123, %c0_124] : memref<1x6x6x64xbf16, #tpu.memory_space<vmem>>, vector<1x1x4x64xbf16>
    %97 = vector.shape_cast %96 : vector<1x1x4x64xbf16> to vector<4x64xbf16>
    %cst_125 = arith.constant dense<0.000000e+00> : vector<4x128xf32>
    %98 = tpu.matmul %97, %87, %cst_125 {dimension_numbers = #tpu.dot_dimension_numbers<[1], [0], [0], [1], [0, 0, 1, 1], [], []>} : vector<4x64xbf16>, vector<64x128xbf16>, vector<4x128xf32> -> vector<4x128xf32>
    %99 = arith.addf %81, %98 : vector<4x128xf32>
    %c0_126 = arith.constant 0 : index
    %c4_127 = arith.constant 4 : index
    %c2_128 = arith.constant 2 : index
    %c0_129 = arith.constant 0 : index
    %100 = vector.load %arg1[%c0_126, %c4_127, %c2_128, %c0_129] : memref<1x6x6x64xbf16, #tpu.memory_space<vmem>>, vector<1x1x4x64xbf16>
    %101 = vector.shape_cast %100 : vector<1x1x4x64xbf16> to vector<4x64xbf16>
    %cst_130 = arith.constant dense<0.000000e+00> : vector<4x128xf32>
    %102 = tpu.matmul %101, %87, %cst_130 {dimension_numbers = #tpu.dot_dimension_numbers<[1], [0], [0], [1], [0, 0, 1, 1], [], []>} : vector<4x64xbf16>, vector<64x128xbf16>, vector<4x128xf32> -> vector<4x128xf32>
    %103 = arith.addf %85, %102 : vector<4x128xf32>
    %c6 = arith.constant 6 : index
    %c0_131 = arith.constant 0 : index
    %c0_132 = arith.constant 0 : index
    %104 = vector.load %arg2[%c6, %c0_131, %c0_132] : memref<9x64x128xbf16, #tpu.memory_space<vmem>>, vector<1x64x128xbf16>
    %105 = vector.shape_cast %104 : vector<1x64x128xbf16> to vector<64x128xbf16>
    %c0_133 = arith.constant 0 : index
    %c2_134 = arith.constant 2 : index
    %c0_135 = arith.constant 0 : index
    %c0_136 = arith.constant 0 : index
    %106 = vector.load %arg1[%c0_133, %c2_134, %c0_135, %c0_136] : memref<1x6x6x64xbf16, #tpu.memory_space<vmem>>, vector<1x1x4x64xbf16>
    %107 = vector.shape_cast %106 : vector<1x1x4x64xbf16> to vector<4x64xbf16>
    %cst_137 = arith.constant dense<0.000000e+00> : vector<4x128xf32>
    %108 = tpu.matmul %107, %105, %cst_137 {dimension_numbers = #tpu.dot_dimension_numbers<[1], [0], [0], [1], [0, 0, 1, 1], [], []>} : vector<4x64xbf16>, vector<64x128xbf16>, vector<4x128xf32> -> vector<4x128xf32>
    %109 = arith.addf %91, %108 : vector<4x128xf32>
    %c0_138 = arith.constant 0 : index
    %c3_139 = arith.constant 3 : index
    %c0_140 = arith.constant 0 : index
    %c0_141 = arith.constant 0 : index
    %110 = vector.load %arg1[%c0_138, %c3_139, %c0_140, %c0_141] : memref<1x6x6x64xbf16, #tpu.memory_space<vmem>>, vector<1x1x4x64xbf16>
    %111 = vector.shape_cast %110 : vector<1x1x4x64xbf16> to vector<4x64xbf16>
    %cst_142 = arith.constant dense<0.000000e+00> : vector<4x128xf32>
    %112 = tpu.matmul %111, %105, %cst_142 {dimension_numbers = #tpu.dot_dimension_numbers<[1], [0], [0], [1], [0, 0, 1, 1], [], []>} : vector<4x64xbf16>, vector<64x128xbf16>, vector<4x128xf32> -> vector<4x128xf32>
    %113 = arith.addf %95, %112 : vector<4x128xf32>
    %c0_143 = arith.constant 0 : index
    %c4_144 = arith.constant 4 : index
    %c0_145 = arith.constant 0 : index
    %c0_146 = arith.constant 0 : index
    %114 = vector.load %arg1[%c0_143, %c4_144, %c0_145, %c0_146] : memref<1x6x6x64xbf16, #tpu.memory_space<vmem>>, vector<1x1x4x64xbf16>
    %115 = vector.shape_cast %114 : vector<1x1x4x64xbf16> to vector<4x64xbf16>
    %cst_147 = arith.constant dense<0.000000e+00> : vector<4x128xf32>
    %116 = tpu.matmul %115, %105, %cst_147 {dimension_numbers = #tpu.dot_dimension_numbers<[1], [0], [0], [1], [0, 0, 1, 1], [], []>} : vector<4x64xbf16>, vector<64x128xbf16>, vector<4x128xf32> -> vector<4x128xf32>
    %117 = arith.addf %99, %116 : vector<4x128xf32>
    %c0_148 = arith.constant 0 : index
    %c5_149 = arith.constant 5 : index
    %c0_150 = arith.constant 0 : index
    %c0_151 = arith.constant 0 : index
    %118 = vector.load %arg1[%c0_148, %c5_149, %c0_150, %c0_151] : memref<1x6x6x64xbf16, #tpu.memory_space<vmem>>, vector<1x1x4x64xbf16>
    %119 = vector.shape_cast %118 : vector<1x1x4x64xbf16> to vector<4x64xbf16>
    %cst_152 = arith.constant dense<0.000000e+00> : vector<4x128xf32>
    %120 = tpu.matmul %119, %105, %cst_152 {dimension_numbers = #tpu.dot_dimension_numbers<[1], [0], [0], [1], [0, 0, 1, 1], [], []>} : vector<4x64xbf16>, vector<64x128xbf16>, vector<4x128xf32> -> vector<4x128xf32>
    %121 = arith.addf %103, %120 : vector<4x128xf32>
    %c7 = arith.constant 7 : index
    %c0_153 = arith.constant 0 : index
    %c0_154 = arith.constant 0 : index
    %122 = vector.load %arg2[%c7, %c0_153, %c0_154] : memref<9x64x128xbf16, #tpu.memory_space<vmem>>, vector<1x64x128xbf16>
    %123 = vector.shape_cast %122 : vector<1x64x128xbf16> to vector<64x128xbf16>
    %c0_155 = arith.constant 0 : index
    %c2_156 = arith.constant 2 : index
    %c1_157 = arith.constant 1 : index
    %c0_158 = arith.constant 0 : index
    %124 = vector.load %arg1[%c0_155, %c2_156, %c1_157, %c0_158] : memref<1x6x6x64xbf16, #tpu.memory_space<vmem>>, vector<1x1x4x64xbf16>
    %125 = vector.shape_cast %124 : vector<1x1x4x64xbf16> to vector<4x64xbf16>
    %cst_159 = arith.constant dense<0.000000e+00> : vector<4x128xf32>
    %126 = tpu.matmul %125, %123, %cst_159 {dimension_numbers = #tpu.dot_dimension_numbers<[1], [0], [0], [1], [0, 0, 1, 1], [], []>} : vector<4x64xbf16>, vector<64x128xbf16>, vector<4x128xf32> -> vector<4x128xf32>
    %127 = arith.addf %109, %126 : vector<4x128xf32>
    %c0_160 = arith.constant 0 : index
    %c3_161 = arith.constant 3 : index
    %c1_162 = arith.constant 1 : index
    %c0_163 = arith.constant 0 : index
    %128 = vector.load %arg1[%c0_160, %c3_161, %c1_162, %c0_163] : memref<1x6x6x64xbf16, #tpu.memory_space<vmem>>, vector<1x1x4x64xbf16>
    %129 = vector.shape_cast %128 : vector<1x1x4x64xbf16> to vector<4x64xbf16>
    %cst_164 = arith.constant dense<0.000000e+00> : vector<4x128xf32>
    %130 = tpu.matmul %129, %123, %cst_164 {dimension_numbers = #tpu.dot_dimension_numbers<[1], [0], [0], [1], [0, 0, 1, 1], [], []>} : vector<4x64xbf16>, vector<64x128xbf16>, vector<4x128xf32> -> vector<4x128xf32>
    %131 = arith.addf %113, %130 : vector<4x128xf32>
    %c0_165 = arith.constant 0 : index
    %c4_166 = arith.constant 4 : index
    %c1_167 = arith.constant 1 : index
    %c0_168 = arith.constant 0 : index
    %132 = vector.load %arg1[%c0_165, %c4_166, %c1_167, %c0_168] : memref<1x6x6x64xbf16, #tpu.memory_space<vmem>>, vector<1x1x4x64xbf16>
    %133 = vector.shape_cast %132 : vector<1x1x4x64xbf16> to vector<4x64xbf16>
    %cst_169 = arith.constant dense<0.000000e+00> : vector<4x128xf32>
    %134 = tpu.matmul %133, %123, %cst_169 {dimension_numbers = #tpu.dot_dimension_numbers<[1], [0], [0], [1], [0, 0, 1, 1], [], []>} : vector<4x64xbf16>, vector<64x128xbf16>, vector<4x128xf32> -> vector<4x128xf32>
    %135 = arith.addf %117, %134 : vector<4x128xf32>
    %c0_170 = arith.constant 0 : index
    %c5_171 = arith.constant 5 : index
    %c1_172 = arith.constant 1 : index
    %c0_173 = arith.constant 0 : index
    %136 = vector.load %arg1[%c0_170, %c5_171, %c1_172, %c0_173] : memref<1x6x6x64xbf16, #tpu.memory_space<vmem>>, vector<1x1x4x64xbf16>
    %137 = vector.shape_cast %136 : vector<1x1x4x64xbf16> to vector<4x64xbf16>
    %cst_174 = arith.constant dense<0.000000e+00> : vector<4x128xf32>
    %138 = tpu.matmul %137, %123, %cst_174 {dimension_numbers = #tpu.dot_dimension_numbers<[1], [0], [0], [1], [0, 0, 1, 1], [], []>} : vector<4x64xbf16>, vector<64x128xbf16>, vector<4x128xf32> -> vector<4x128xf32>
    %139 = arith.addf %121, %138 : vector<4x128xf32>
    %c8 = arith.constant 8 : index
    %c0_175 = arith.constant 0 : index
    %c0_176 = arith.constant 0 : index
    %140 = vector.load %arg2[%c8, %c0_175, %c0_176] : memref<9x64x128xbf16, #tpu.memory_space<vmem>>, vector<1x64x128xbf16>
    %141 = vector.shape_cast %140 : vector<1x64x128xbf16> to vector<64x128xbf16>
    %c0_177 = arith.constant 0 : index
    %c2_178 = arith.constant 2 : index
    %c2_179 = arith.constant 2 : index
    %c0_180 = arith.constant 0 : index
    %142 = vector.load %arg1[%c0_177, %c2_178, %c2_179, %c0_180] : memref<1x6x6x64xbf16, #tpu.memory_space<vmem>>, vector<1x1x4x64xbf16>
    %143 = vector.shape_cast %142 : vector<1x1x4x64xbf16> to vector<4x64xbf16>
    %cst_181 = arith.constant dense<0.000000e+00> : vector<4x128xf32>
    %144 = tpu.matmul %143, %141, %cst_181 {dimension_numbers = #tpu.dot_dimension_numbers<[1], [0], [0], [1], [0, 0, 1, 1], [], []>} : vector<4x64xbf16>, vector<64x128xbf16>, vector<4x128xf32> -> vector<4x128xf32>
    %145 = arith.addf %127, %144 : vector<4x128xf32>
    %c0_182 = arith.constant 0 : index
    %c3_183 = arith.constant 3 : index
    %c2_184 = arith.constant 2 : index
    %c0_185 = arith.constant 0 : index
    %146 = vector.load %arg1[%c0_182, %c3_183, %c2_184, %c0_185] : memref<1x6x6x64xbf16, #tpu.memory_space<vmem>>, vector<1x1x4x64xbf16>
    %147 = vector.shape_cast %146 : vector<1x1x4x64xbf16> to vector<4x64xbf16>
    %cst_186 = arith.constant dense<0.000000e+00> : vector<4x128xf32>
    %148 = tpu.matmul %147, %141, %cst_186 {dimension_numbers = #tpu.dot_dimension_numbers<[1], [0], [0], [1], [0, 0, 1, 1], [], []>} : vector<4x64xbf16>, vector<64x128xbf16>, vector<4x128xf32> -> vector<4x128xf32>
    %149 = arith.addf %131, %148 : vector<4x128xf32>
    %c0_187 = arith.constant 0 : index
    %c4_188 = arith.constant 4 : index
    %c2_189 = arith.constant 2 : index
    %c0_190 = arith.constant 0 : index
    %150 = vector.load %arg1[%c0_187, %c4_188, %c2_189, %c0_190] : memref<1x6x6x64xbf16, #tpu.memory_space<vmem>>, vector<1x1x4x64xbf16>
    %151 = vector.shape_cast %150 : vector<1x1x4x64xbf16> to vector<4x64xbf16>
    %cst_191 = arith.constant dense<0.000000e+00> : vector<4x128xf32>
    %152 = tpu.matmul %151, %141, %cst_191 {dimension_numbers = #tpu.dot_dimension_numbers<[1], [0], [0], [1], [0, 0, 1, 1], [], []>} : vector<4x64xbf16>, vector<64x128xbf16>, vector<4x128xf32> -> vector<4x128xf32>
    %153 = arith.addf %135, %152 : vector<4x128xf32>
    %c0_192 = arith.constant 0 : index
    %c5_193 = arith.constant 5 : index
    %c2_194 = arith.constant 2 : index
    %c0_195 = arith.constant 0 : index
    %154 = vector.load %arg1[%c0_192, %c5_193, %c2_194, %c0_195] : memref<1x6x6x64xbf16, #tpu.memory_space<vmem>>, vector<1x1x4x64xbf16>
    %155 = vector.shape_cast %154 : vector<1x1x4x64xbf16> to vector<4x64xbf16>
    %cst_196 = arith.constant dense<0.000000e+00> : vector<4x128xf32>
    %156 = tpu.matmul %155, %141, %cst_196 {dimension_numbers = #tpu.dot_dimension_numbers<[1], [0], [0], [1], [0, 0, 1, 1], [], []>} : vector<4x64xbf16>, vector<64x128xbf16>, vector<4x128xf32> -> vector<4x128xf32>
    %157 = arith.addf %139, %156 : vector<4x128xf32>
    %c0_197 = arith.constant 0 : index
    %c0_198 = arith.constant 0 : index
    %158 = vector.load %arg3[%c0_197, %c0_198] : memref<1x128xf32, #tpu.memory_space<vmem>>, vector<1x128xf32>
    %159 = vector.broadcast %158 : vector<1x128xf32> to vector<4x128xf32>
    %160 = arith.addf %145, %159 : vector<4x128xf32>
    %161 = arith.truncf %160 : vector<4x128xf32> to vector<4x128xbf16>
    %c0_199 = arith.constant 0 : index
    %c0_200 = arith.constant 0 : index
    %c0_201 = arith.constant 0 : index
    %c0_202 = arith.constant 0 : index
    %162 = vector.load %arg4[%c0_199, %c0_200, %c0_201, %c0_202] : memref<1x4x4x128xbf16, #tpu.memory_space<vmem>>, vector<1x1x4x128xbf16>
    %163 = vector.shape_cast %162 : vector<1x1x4x128xbf16> to vector<4x128xbf16>
    %164 = vector.shape_cast %161 : vector<4x128xbf16> to vector<1x1x4x128xbf16>
    tpu.vector_store %arg4[%c0_199, %c0_200, %c0_201, %c0_202], %164 {strides = array<i32>} : memref<1x4x4x128xbf16, #tpu.memory_space<vmem>>, vector<1x1x4x128xbf16>,
    %c0_203 = arith.constant 0 : index
    %c0_204 = arith.constant 0 : index
    %165 = vector.load %arg3[%c0_203, %c0_204] : memref<1x128xf32, #tpu.memory_space<vmem>>, vector<1x128xf32>
    %166 = vector.broadcast %165 : vector<1x128xf32> to vector<4x128xf32>
    %167 = arith.addf %149, %166 : vector<4x128xf32>
    %168 = arith.truncf %167 : vector<4x128xf32> to vector<4x128xbf16>
    %c0_205 = arith.constant 0 : index
    %c1_206 = arith.constant 1 : index
    %c0_207 = arith.constant 0 : index
    %c0_208 = arith.constant 0 : index
    %169 = vector.load %arg4[%c0_205, %c1_206, %c0_207, %c0_208] : memref<1x4x4x128xbf16, #tpu.memory_space<vmem>>, vector<1x1x4x128xbf16>
    %170 = vector.shape_cast %169 : vector<1x1x4x128xbf16> to vector<4x128xbf16>
    %171 = vector.shape_cast %168 : vector<4x128xbf16> to vector<1x1x4x128xbf16>
    tpu.vector_store %arg4[%c0_205, %c1_206, %c0_207, %c0_208], %171 {strides = array<i32>} : memref<1x4x4x128xbf16, #tpu.memory_space<vmem>>, vector<1x1x4x128xbf16>,
    %c0_209 = arith.constant 0 : index
    %c0_210 = arith.constant 0 : index
    %172 = vector.load %arg3[%c0_209, %c0_210] : memref<1x128xf32, #tpu.memory_space<vmem>>, vector<1x128xf32>
    %173 = vector.broadcast %172 : vector<1x128xf32> to vector<4x128xf32>
    %174 = arith.addf %153, %173 : vector<4x128xf32>
    %175 = arith.truncf %174 : vector<4x128xf32> to vector<4x128xbf16>
    %c0_211 = arith.constant 0 : index
    %c2_212 = arith.constant 2 : index
    %c0_213 = arith.constant 0 : index
    %c0_214 = arith.constant 0 : index
    %176 = vector.load %arg4[%c0_211, %c2_212, %c0_213, %c0_214] : memref<1x4x4x128xbf16, #tpu.memory_space<vmem>>, vector<1x1x4x128xbf16>
    %177 = vector.shape_cast %176 : vector<1x1x4x128xbf16> to vector<4x128xbf16>
    %178 = vector.shape_cast %175 : vector<4x128xbf16> to vector<1x1x4x128xbf16>
    tpu.vector_store %arg4[%c0_211, %c2_212, %c0_213, %c0_214], %178 {strides = array<i32>} : memref<1x4x4x128xbf16, #tpu.memory_space<vmem>>, vector<1x1x4x128xbf16>,
    %c0_215 = arith.constant 0 : index
    %c0_216 = arith.constant 0 : index
    %179 = vector.load %arg3[%c0_215, %c0_216] : memref<1x128xf32, #tpu.memory_space<vmem>>, vector<1x128xf32>
    %180 = vector.broadcast %179 : vector<1x128xf32> to vector<4x128xf32>
    %181 = arith.addf %157, %180 : vector<4x128xf32>
    %182 = arith.truncf %181 : vector<4x128xf32> to vector<4x128xbf16>
    %c0_217 = arith.constant 0 : index
    %c3_218 = arith.constant 3 : index
    %c0_219 = arith.constant 0 : index
    %c0_220 = arith.constant 0 : index
    %183 = vector.load %arg4[%c0_217, %c3_218, %c0_219, %c0_220] : memref<1x4x4x128xbf16, #tpu.memory_space<vmem>>, vector<1x1x4x128xbf16>
    %184 = vector.shape_cast %183 : vector<1x1x4x128xbf16> to vector<4x128xbf16>
    %185 = vector.shape_cast %182 : vector<4x128xbf16> to vector<1x1x4x128xbf16>
    tpu.vector_store %arg4[%c0_217, %c3_218, %c0_219, %c0_220], %185 {strides = array<i32>} : memref<1x4x4x128xbf16, #tpu.memory_space<vmem>>, vector<1x1x4x128xbf16>,
    return
  }
  func.func @transform_0(%arg0: i32) -> (i32, i32, i32, i32) {
    %c0_i32 = arith.constant 0 : i32
    %c0_i32_0 = arith.constant 0 : i32
    %c0_i32_1 = arith.constant 0 : i32
    %c0_i32_2 = arith.constant 0 : i32
    return %arg0, %c0_i32, %c0_i32_0, %c0_i32_1 : i32, i32, i32, i32
  }
  func.func @transform_1(%arg0: i32) -> (i32, i32, i32) {
    %c0_i32 = arith.constant 0 : i32
    %c0_i32_0 = arith.constant 0 : i32
    %c0_i32_1 = arith.constant 0 : i32
    %c0_i32_2 = arith.constant 0 : i32
    return %c0_i32, %c0_i32_0, %c0_i32_1 : i32, i32, i32
  }
  func.func @transform_2(%arg0: i32) -> (i32, i32) {
    %c0_i32 = arith.constant 0 : i32
    %c0_i32_0 = arith.constant 0 : i32
    %c0_i32_1 = arith.constant 0 : i32
    return %c0_i32, %c0_i32_0 : i32, i32
  }
  func.func @transform_3(%arg0: i32) -> (i32, i32, i32, i32) {
    %c0_i32 = arith.constant 0 : i32
    %c0_i32_0 = arith.constant 0 : i32
    %c0_i32_1 = arith.constant 0 : i32
    %c0_i32_2 = arith.constant 0 : i32
    return %arg0, %c0_i32, %c0_i32_0, %c0_i32_1 : i32, i32, i32, i32
  }
}

</mosaic_0001>

<bundles_post_ra>
// kernel: tpu_custom_call.1
= control target key start
LH: loop header
LB: loop body
LE: loop exit
PB: predicated region body
PF: predicated region fallthrough
CT: control target
= control target key end

     0   :  { %8 = vsyncpa [#allocation3], 0  ;;  %s3734_s0 = inlined_call_operand.vmem [shape: bf16[2,6,6,64], index: 0, kind: input, shape index: {}]   ;;  %s3735_s1 = inlined_call_operand.hbm [shape: bf16[9,64,128], index: 1, kind: input, shape index: {}]   ;;  %s3736_s2 = inlined_call_operand.vmem [shape: f32[1,128], index: 2, kind: input, shape index: {}]   ;;  %s3737_s3 = inlined_call_operand.hbm [shape: bf16[2,4,4,128], index: 3, kind: output, shape index: {}]  }
   0x1   :  { %9 = vsyncpa [#allocation4], 0 }
   0x2   :  { %11 = vsyncpa [#allocation4 + $0x1], 0  ;;  %s3203_s12 = smov 0   ;;  %s3205_s13 = smov 0  }
   0x3   :  { %s3207_s14 = smov 0   ;;  %s3209_s15 = smov 0  }
   0x4 LB: > { %s3224_s16 = sadd.s32 4294967295, %s3173_s15   ;;  %s2242_s17 = sadd.s32 4294967294, %s3173_s15   ;;  %s3173_s15 = sphi %s3209_s15, %s3753_s15   ;;  %s3169_s14 = sphi %s3207_s14, %s3752_s14   ;;  %s3165_s13 = sphi %s3205_s13, %s3751_s13   ;;  %s3161_s12 = sphi %s3203_s12, %s3750_s12  }
   0x5   : > { %s3228_s18 = sadd.s32 1, %s3173_s15   ;;  %s92_s19 = sadd.s32 1, %s3169_s14 }
   0x6   : > { %s89_s20 = ssub.s32 %s3173_s15, %s3228_s18  ;;  %p102_p0 = scmp.ne.s32.totalorder %s3169_s14, %s3165_s13 }
   0x7   : > { %p90_p1 = scmp.eq.s32.totalorder %s89_s20, 0  ;;  %p103_p2 = scmp.eq.s32.totalorder %s3224_s16, 1 }
   0x8   : > { %p108_p3 = scmp.ne.s32.totalorder %s3165_s13, %s3161_s12  ;;  %p109_p4 = scmp.eq.s32.totalorder %s2242_s17, 1 }
   0x9   : > { %s3239_s21 = scalar_select %p90_p1, %s3169_s14, %s92_s19  }
   0xa   : > { %p3241_p5 = por %p103_p2, %p102_p0  ;;  %p3245_p6 = por %p109_p4, %p108_p3 }
   0xb   : > { %p2243_p7 = scmp.ge.s32.totalorder %s3173_s15, 1  ;;  %p116_p8 = scmp.lt.s32.totalorder %s3173_s15, 3 }
   0xc   : > { %s3741_s22 = scalar_select %p3241_p5, 1, 0 }
   0xd   : > { %s3742_s23 = scalar_select %p3245_p6, 1, 0 }
   0xe   : > { %p3738_p9 = scmp.eq.s32.totalorder %s3224_s16, 0  ;;  %p3252_p10 = pnand %p2243_p7, %p116_p8 }
   0xf   : > { %s3175_s25 = smov [#allocation2]   ;;  %s3079_s30 = scalar_lea.hbm %s3735_s1, 4608 }
  0x10   : > { %s3743_s24 = scalar_select %p3252_p10, 1, 0 }
  0x11   : > { %s128_s26 = sshll.u32 %s3175_s25, 4  ;;  %p2981_p11 = pneg %p3252_p10  ;;  %s129_s26 = int_to_ptr.vmem [resolvable:$true] %s128_s26 }
  0x12   : > { %p3080_p13 = scmp.ne.s32.totalorder %s3735_s1, %s3079_s30  ;;  %p3086_p3 = scmp.lt.u32.totalorder %s3079_s30, %s3735_s1 }
  0x13   : > { %p3260_p12 = pnand %p3738_p9, %p2981_p11 }
  0x15   : > { %p3081_p0 = pneg %p3260_p12 }
  0x17   : > { %p3082_p1 = pnand %p3081_p0, %p3080_p13 }
  0x19   : > { %p3083_p2 = pneg %p3082_p1 }
  0x1b   : > { %p3088_p4 = pnand %p3086_p3, %p3083_p2 }
  0x1d   : > { %3091 = shalt.err (!%p3088_p4)
}
  0x1e   : > { %s3092_s8 = scalar_lea.vmem %s129_s26, 4608  ;;  %p3100_p9 = scmp.lt.s32.totalorder %s129_s26, %s129_s26 }
  0x1f   : > { %p3093_p7 = scmp.ne.s32.totalorder %s129_s26, %s3092_s8  ;;  %p3101_p6 = scmp.lt.s32.totalorder %s3092_s8, %s3092_s8 }
  0x21   : > { %p3095_p8 = pnand %p3093_p7, %p3081_p0  ;;  %p3102_p5 = por %p3101_p6, %p3100_p9 }
  0x23   : > { %p3096_p11 = pneg %p3095_p8 }
  0x25   : > { %p3103_p10 = pnand %p3102_p5, %p3096_p11 }
  0x27   : > { %3106 = shalt.err (!%p3103_p10)
}
  0x28   : > { %s3176_s9 = smov 64   ;;  %s3177_s10 = smov 4  }
  0x29   : > { %2984 = dma.hbm_to_vmem [thread:$0]  (!%p3260_p12), %s3735_s1, 4608, %s129_s26, [#allocation3], %s3176_s9, %s3176_s9, %s3177_s10  }
  0x2a   : > { %p3745_p13 = scmp.ne.s32.totalorder %s3743_s24, 0 }
  0x2b   : > { %p3746_p1 = scmp.eq.s32.totalorder (!%p3745_p13), %s3224_s16, 0 }
  0x2c   : > { %155 = sbr.rel (%p3745_p13) target bundleno = 575 (0x23f), region = 32 }
  0x33   : > { %3152 = dma.done.wait (%p3746_p1), [#allocation3], 4608   ;;  %p3747_p0 = pmov %p3746_p1 }
  0x34   : > { %p179_p5 = scmp.lt.s32.totalorder %s3224_s16, 1  ;;  %v3178_v0 = vmov 0.0   ;;  %vm3179_vm0 = vmmov 0   ;;  %v3294_v1 = vld [vmem:[#allocation2 + $0x20] sm:$0xff]   ;;  %v3299_v3 = vld [vmem:[#allocation2 + $0x28] sm:$0xff]   ;;  %v3312_v5 = vld [vmem:[#allocation2 + $0x30] sm:$0xff]  }
  0x35   : > { %3154 = vsyncadd (%p3747_p0), [#allocation3], 4294962688  ;;  %2542 = vmatprep.subr.bf16.mxu0 %v3178_v0  ;;  %2554 = vmatprep.subr.bf16.mxu1 %v3178_v0  ;;  %v3296_v2 = vld [vmem:[#allocation2] sm:$0xff]   ;;  %v3303_v4 = vld [vmem:[#allocation2 + $0x8] sm:$0xff]   ;;  %vm244_vm1 = vcmask 523264   ;;  %s176_s27 = sand.u32 1, %s3165_s13  }
  0x36   : > { %2550 = vmatprep.mubr.msk.bf16.mxu0 %vm3179_vm0, %v3178_v0  ;;  %2562 = vmatprep.mubr.msk.bf16.mxu1 %vm3179_vm0, %v3178_v0  ;;  %s180_s19 = scalar_select %p179_p5, %s3224_s16, 1  ;;  %v3316_v6 = vld [vmem:[#allocation2 + $0x10] sm:$0xff]   ;;  %v3321_v8 = vld [vmem:[#allocation2 + $0x38] sm:$0xff]   ;;  %v3043_v32 = vld [vmem:[#allocation2 + $0x40] sm:$0xff]  }
  0x37   : > { %2543 = vmatpush3.bf16.msra.mxu0 %v3294_v1  ;;  %2555 = vmatpush3.bf16.msra.mxu1 %v3296_v2  ;;  %v3325_v11 = vld [vmem:[#allocation2 + $0x18] sm:$0xff]   ;;  %v3044_v34 = vld [vmem:[#allocation2 + $0x48] sm:$0xff]   ;;  %v3045_v35 = vld [vmem:[#allocation2 + $0x50] sm:$0xff]   ;;  %s2248_s30 = sshll.u32 %s176_s27, 3  ;;  %s2361_s6 = sshll.u32 %s3224_s16, 7 }
  0x38   : > { %s2974_s20 = smul.u32 24, %s180_s19  ;;  %2544 = vmatprep.subr.bf16.mxu0 %v3178_v0  ;;  %2556 = vmatprep.subr.bf16.mxu1 %v3178_v0  ;;  %v3046_v37 = vld [vmem:[#allocation2 + $0x58] sm:$0xff]   ;;  %v3051_v45 = vld [vmem:[#allocation2 + $0x60] sm:$0xff]   ;;  %v3052_v46 = vld [vmem:[#allocation2 + $0x68] sm:$0xff]   ;;  %s178_s4 = scalar_lea.vmem [#allocation5], %s2248_s30 }
  0x39   : > { %v3053_v47 = vld [vmem:[#allocation2 + $0x70] sm:$0xff]   ;;  %v3054_v48 = vld [vmem:[#allocation2 + $0x78] sm:$0xff]   ;;  %v3055_v49 = vld [vmem:[#allocation2 + $0x80] sm:$0xff]   ;;  %s2168_s5 = sshll.u32 %s178_s4, 4  ;;  %s3689_s9 = scalar_lea.hbm %s3737_s3, %s2361_s6  ;;  %s3684_s5 = int_to_ptr.vmem [resolvable:$true] %s2168_s5 }
  0x3a   : > { %s3309_s26 = scalar_lea.vmem %s3734_s0, %s2974_s20  ;;  %v3056_v51 = vld [vmem:[#allocation2 + $0x88] sm:$0xff]   ;;  %v3057_v52 = vld [vmem:[#allocation2 + $0x90] sm:$0xff]   ;;  %v3058_v53 = vld [vmem:[#allocation2 + $0x98] sm:$0xff]   ;;  %s3693_s16 = scalar_lea.sflag [#allocation4], %s176_s27 }
  0x3b   : > { %2545 = vmatpush3.bf16.msra.mxu0 %v3299_v3  ;;  %2557 = vmatpush3.bf16.msra.mxu1 %v3303_v4  ;;  %v3039_v7 = vld [vmem:[%s3309_s26] ss:$0 sps:$4 sm:$0x77]   ;;  %v3040_v15 = vld [vmem:[%s3309_s26 + $0x4] ss:$0 sps:$4 sm:$0x77]  }
  0x3c   : > { %2546 = vmatprep.subr.bf16.mxu0 %v3178_v0  ;;  %2558 = vmatprep.subr.bf16.mxu1 %v3178_v0  ;;  %v214_v9 = vshrl.u32 %v3039_v7, 16  ;;  %v216_v10 = vshll.u32 %v3039_v7, 16  ;;  %v193_v14 = vld [vmem:[%s3309_s26] sm:$0x3]  ;;  %v362_v16 = vshll.u32 %v3040_v15, 16  ;;  %v360_v17 = vshrl.u32 %v3040_v15, 16 }
  0x3d   : > { %v3355_v20 = vld [vmem:[%s3309_s26 + $0x4] sm:$0x3]  ;;  %v3041_v21 = vld [vmem:[%s3309_s26 + $0x8] ss:$0 sps:$4 sm:$0x77]   ;;  %v3060_v59 = vld [vmem:[#allocation2 + $0xa0] sm:$0xff]  }
  0x3e   : > { %v218_v12 = vrot.slane %v216_v10, 1  ;;  %v364_v18 = vrot.slane %v362_v16, 1  ;;  %v459_v22 = vshll.u32 %v3041_v21, 16  ;;  %v457_v23 = vshrl.u32 %v3041_v21, 16  ;;  %v3387_v26 = vld [vmem:[%s3309_s26 + $0x8] sm:$0x3] }
  0x3f   : > { %2547 = vmatpush3.bf16.msra.mxu0 %v3312_v5  ;;  %2559 = vmatpush3.bf16.msra.mxu1 %v3316_v6  ;;  %v3042_v27 = vld [vmem:[%s3309_s26 + $0xc] ss:$0 sps:$4 sm:$0x77]   ;;  %v3047_v36 = vld [vmem:[%s3309_s26] ss:$0 sps:$4 sm:$0x66]  }
  0x40   : > { %2548 = vmatprep.subr.bf16.mxu0 %v3178_v0  ;;  %2560 = vmatprep.subr.bf16.mxu1 %v3178_v0  ;;  %v219_v13 = vor.u32 %v218_v12, %v214_v9  ;;  %v3352_v19 = vor.u32 %v364_v18, %v360_v17  ;;  %v461_v24 = vrot.slane %v459_v22, 1  ;;  %v556_v28 = vshll.u32 %v3042_v27, 16  ;;  %v3417_v33 = vld [vmem:[%s3309_s26 + $0xc] sm:$0x3]  ;;  %v3495_v50 = vld [vmem:[%s3309_s26 + $0x10] sm:$0x3] }
  0x41   : > { %v554_v29 = vshrl.u32 %v3042_v27, 16  ;;  %v3435_v38 = vld [vmem:[%s3309_s26 + $0x4] ss:$0 sps:$4 sm:$0x66]   ;;  %v659_v39 = vrot.slane %v3047_v36, 1  ;;  %v3061_v60 = vld [vmem:[#allocation2 + $0xa8] sm:$0xff]  }
  0x42   : > { %v3382_v25 = vor.u32 %v461_v24, %v457_v23  ;;  %v558_v30 = vrot.slane %v556_v28, 1  ;;  %v732_v40 = vrot.slane %v3435_v38, 1  ;;  %v3049_v41 = vld [vmem:[%s3309_s26 + $0x8] ss:$0 sps:$4 sm:$0x66]   ;;  %v3062_v61 = vld [vmem:[#allocation2 + $0xb0] sm:$0xff]  }
  0x43   : > { %2549 = vmatpush3.bf16.msra.mxu0 %v3321_v8  ;;  %2561 = vmatpush3.bf16.msra.mxu1 %v3325_v11  ;;  %v3050_v42 = vld [vmem:[%s3309_s26 + $0xc] ss:$0 sps:$4 sm:$0x66]   ;;  %v3458_v43 = vrot.slane %v3049_v41, 1  ;;  %v2327_v7 = vld [vmem:[%s3309_s26 + $0x14] sm:$0x3] }
  0x44   : > { %2566 = vmatprep.subr.bf16.mxu0 %v3178_v0  ;;  %2578 = vmatprep.subr.bf16.mxu1 %v3178_v0  ;;  %v3412_v31 = vor.u32 %v558_v30, %v554_v29  ;;  %v3460_v44 = vrot.slane %v3050_v42, 1  ;;  %v3059_v54 = vld [vmem:[%s3309_s26 + $0x10] ss:$0 sps:$4 sm:$0x77]   ;;  %v3063_v62 = vld [vmem:[#allocation2 + $0xb8] sm:$0xff]   ;;  %v3071_v15 = vld [vmem:[#allocation2 + $0xf0] sm:$0xff]  }
  0x45   : > { %v1240_v55 = vshll.u32 %v3059_v54, 16  ;;  %v1238_v56 = vshrl.u32 %v3059_v54, 16  ;;  %v3564_v63 = vld [vmem:[%s3309_s26 + $0x10] ss:$0 sps:$4 sm:$0x66]   ;;  %v3076_v42 = vld [vmem:[#allocation2 + $0x110] sm:$0xff]  }
  0x46   : > { %2551 = vmatmul.mubr.msk.bf16.vlgmr.msra.gmra.mrb[0].mxu0 %vm244_vm1, %v219_v13  ;;  %2563 = vmatmul.mubr.msk.bf16.vlgmr.msra.gmra.mrb[0].mxu1 %vm244_vm1, %v193_v14  ;;  %s3107_s10 = scalar_lea.vmem %s3684_s5, 128  ;;  %p3748_p9 = scmp.ne.s32.totalorder %s3741_s22, 0 }
  0x47   : > { %2567 = vmatpush3.bf16.msra.mxu0 %v3294_v1  ;;  %2579 = vmatpush3.bf16.msra.mxu1 %v3296_v2  ;;  %v1242_v57 = vrot.slane %v1240_v55, 1  ;;  %p3108_p6 = scmp.ne.s32.totalorder %s3684_s5, %s3107_s10  ;;  %s3180_s11 = smov [#allocation5]  }
  0x48   : > { %2568 = vmatprep.subr.bf16.mxu0 %v3178_v0  ;;  %2580 = vmatprep.subr.bf16.mxu1 %v3178_v0  ;;  %s3111_s17 = sshll.u32 %s3180_s11, 4  ;;  %s3112_s17 = int_to_ptr.vmem [resolvable:$false] %s3111_s17 }
  0x49   : > { %2574 = vmatprep.mubr.msk.bf16.mxu0 %vm3179_vm0, %v3178_v0  ;;  %2586 = vmatprep.mubr.msk.bf16.mxu1 %vm3179_vm0, %v3178_v0  ;;  %v3530_v58 = vor.u32 %v1242_v57, %v1238_v56  ;;  %v3078_v56 = vld [vmem:[%s3309_s26 + $0x14] ss:$0 sps:$4 sm:$0x66]   ;;  %p3109_p10 = pnand %p3108_p6, %p3748_p9  ;;  %s3113_s19 = scalar_lea.vmem %s3112_s17, 256 }
  0x4a   : > { %v2066_v57 = vrot.slane %v3078_v56, 1  ;;  %p3114_p2 = scmp.lt.s32.totalorder %s3684_s5, %s3112_s17  ;;  %p3115_p3 = scmp.lt.s32.totalorder %s3113_s19, %s3107_s10 }
  0x4b   : > { %2569 = vmatpush3.bf16.msra.mxu0 %v3299_v3  ;;  %2581 = vmatpush3.bf16.msra.mxu1 %v3303_v4  ;;  %p3110_p12 = pneg %p3109_p10 }
  0x4c   : > { %2570 = vmatprep.subr.bf16.mxu0 %v3178_v0  ;;  %2582 = vmatprep.subr.bf16.mxu1 %v3178_v0  ;;  %p3116_p4 = por %p3115_p3, %p3114_p2 }
  0x4e   : > { %p3117_p7 = pnand %p3116_p4, %p3110_p12 }
  0x4f   : > { %2571 = vmatpush3.bf16.msra.mxu0 %v3312_v5  ;;  %2583 = vmatpush3.bf16.msra.mxu1 %v3316_v6 }
  0x50   : > { %2572 = vmatprep.subr.bf16.mxu0 %v3178_v0  ;;  %2584 = vmatprep.subr.bf16.mxu1 %v3178_v0 }
  0x53   : > { %2573 = vmatpush3.bf16.msra.mxu0 %v3321_v8  ;;  %2585 = vmatpush3.bf16.msra.mxu1 %v3325_v11 }
  0x54   : > { %2590 = vmatprep.subr.bf16.mxu0 %v3178_v0  ;;  %2602 = vmatprep.subr.bf16.mxu1 %v3178_v0 }
  0x56   : > { %2575 = vmatmul.mubr.msk.bf16.vlgmr.msra.gmra.mrb[4].mxu0 %vm244_vm1, %v3352_v19  ;;  %2587 = vmatmul.mubr.msk.bf16.vlgmr.msra.gmra.mrb[4].mxu1 %vm244_vm1, %v3355_v20 }
  0x57   : > { %2591 = vmatpush3.bf16.msra.mxu0 %v3294_v1  ;;  %2603 = vmatpush3.bf16.msra.mxu1 %v3296_v2 }
  0x58   : > { %2592 = vmatprep.subr.bf16.mxu0 %v3178_v0  ;;  %2604 = vmatprep.subr.bf16.mxu1 %v3178_v0 }
  0x59   : > { %2598 = vmatprep.mubr.msk.bf16.mxu0 %vm3179_vm0, %v3178_v0  ;;  %2610 = vmatprep.mubr.msk.bf16.mxu1 %vm3179_vm0, %v3178_v0 }
  0x5b   : > { %2593 = vmatpush3.bf16.msra.mxu0 %v3299_v3  ;;  %2605 = vmatpush3.bf16.msra.mxu1 %v3303_v4 }
  0x5c   : > { %2594 = vmatprep.subr.bf16.mxu0 %v3178_v0  ;;  %2606 = vmatprep.subr.bf16.mxu1 %v3178_v0 }
  0x5f   : > { %2595 = vmatpush3.bf16.msra.mxu0 %v3312_v5  ;;  %2607 = vmatpush3.bf16.msra.mxu1 %v3316_v6 }
  0x60   : > { %2596 = vmatprep.subr.bf16.mxu0 %v3178_v0  ;;  %2608 = vmatprep.subr.bf16.mxu1 %v3178_v0 }
  0x63   : > { %2597 = vmatpush3.bf16.msra.mxu0 %v3321_v8  ;;  %2609 = vmatpush3.bf16.msra.mxu1 %v3325_v11 }
  0x64   : > { %2614 = vmatprep.subr.bf16.mxu0 %v3178_v0  ;;  %2626 = vmatprep.subr.bf16.mxu1 %v3178_v0 }
  0x66   : > { %2599 = vmatmul.mubr.msk.bf16.vlgmr.msra.gmra.mrb[8].mxu0 %vm244_vm1, %v3382_v25  ;;  %2611 = vmatmul.mubr.msk.bf16.vlgmr.msra.gmra.mrb[8].mxu1 %vm244_vm1, %v3387_v26 }
  0x67   : > { %2615 = vmatpush3.bf16.msra.mxu0 %v3294_v1  ;;  %2627 = vmatpush3.bf16.msra.mxu1 %v3296_v2  ;;  %v1448_v1 = vrot.slane %v3564_v63, 1  ;;  %v3065_v2 = vld [vmem:[#allocation2 + $0xc0] sm:$0xff]  }
  0x68   : > { %2616 = vmatprep.subr.bf16.mxu0 %v3178_v0  ;;  %2628 = vmatprep.subr.bf16.mxu1 %v3178_v0 }
  0x69   : > { %2622 = vmatprep.mubr.msk.bf16.mxu0 %vm3179_vm0, %v3178_v0  ;;  %2634 = vmatprep.mubr.msk.bf16.mxu1 %vm3179_vm0, %v3178_v0 }
  0x6b   : > { %2617 = vmatpush3.bf16.msra.mxu0 %v3299_v3  ;;  %2629 = vmatpush3.bf16.msra.mxu1 %v3303_v4  ;;  %v3066_v3 = vld [vmem:[#allocation2 + $0xc8] sm:$0xff]   ;;  %v3067_v4 = vld [vmem:[#allocation2 + $0xd0] sm:$0xff]  }
  0x6c   : > { %2618 = vmatprep.subr.bf16.mxu0 %v3178_v0  ;;  %2630 = vmatprep.subr.bf16.mxu1 %v3178_v0 }
  0x6f   : > { %2619 = vmatpush3.bf16.msra.mxu0 %v3312_v5  ;;  %2631 = vmatpush3.bf16.msra.mxu1 %v3316_v6  ;;  %v3068_v5 = vld [vmem:[#allocation2 + $0xd8] sm:$0xff]   ;;  %v3069_v6 = vld [vmem:[#allocation2 + $0xe0] sm:$0xff]  }
  0x70   : > { %2620 = vmatprep.subr.bf16.mxu0 %v3178_v0  ;;  %2632 = vmatprep.subr.bf16.mxu1 %v3178_v0 }
  0x73   : > { %2621 = vmatpush3.bf16.msra.mxu0 %v3321_v8  ;;  %2633 = vmatpush3.bf16.msra.mxu1 %v3325_v11  ;;  %v3070_v8 = vld [vmem:[#allocation2 + $0xe8] sm:$0xff]  }
  0x74   : > { %2638 = vmatprep.subr.bf16.mxu0 %v3178_v0  ;;  %2650 = vmatprep.subr.bf16.mxu1 %v3178_v0 }
  0x76   : > { %2623 = vmatmul.mubr.msk.bf16.vlgmr.msra.gmra.mrb[12].mxu0 %vm244_vm1, %v3412_v31  ;;  %2635 = vmatmul.mubr.msk.bf16.vlgmr.msra.gmra.mrb[12].mxu1 %vm244_vm1, %v3417_v33 }
  0x77   : > { %2639 = vmatpush3.bf16.msra.mxu0 %v3043_v32  ;;  %2651 = vmatpush3.bf16.msra.mxu1 %v3043_v32 }
  0x78   : > { %2640 = vmatprep.subr.bf16.mxu0 %v3178_v0  ;;  %2652 = vmatprep.subr.bf16.mxu1 %v3178_v0 }
  0x79   : > { %2646 = vmatprep.mubr.msk.bf16.mxu0 %vm3179_vm0, %v3178_v0  ;;  %2658 = vmatprep.mubr.msk.bf16.mxu1 %vm3179_vm0, %v3178_v0 }
  0x7b   : > { %2641 = vmatpush3.bf16.msra.mxu0 %v3044_v34  ;;  %2653 = vmatpush3.bf16.msra.mxu1 %v3044_v34 }
  0x7c   : > { %2642 = vmatprep.subr.bf16.mxu0 %v3178_v0  ;;  %2654 = vmatprep.subr.bf16.mxu1 %v3178_v0 }
  0x7f   : > { %2643 = vmatpush3.bf16.msra.mxu0 %v3045_v35  ;;  %2655 = vmatpush3.bf16.msra.mxu1 %v3045_v35 }
  0x80   : > { %2644 = vmatprep.subr.bf16.mxu0 %v3178_v0  ;;  %2656 = vmatprep.subr.bf16.mxu1 %v3178_v0 }
  0x83   : > { %2645 = vmatpush3.bf16.msra.mxu0 %v3046_v37  ;;  %2657 = vmatpush3.bf16.msra.mxu1 %v3046_v37 }
  0x84   : > { %2662 = vmatprep.subr.bf16.mxu0 %v3178_v0  ;;  %2674 = vmatprep.subr.bf16.mxu1 %v3178_v0 }
  0x86   : > { %2647 = vmatmul.mubr.msk.bf16.vlgmr.msra.gmra.mrb[16].mxu0 %vm244_vm1, %v659_v39  ;;  %2659 = vmatmul.mubr.msk.bf16.vlgmr.msra.gmra.mrb[16].mxu1 %vm244_vm1, %v732_v40 }
  0x87   : > { %2663 = vmatpush3.bf16.msra.mxu0 %v3043_v32  ;;  %2675 = vmatpush3.bf16.msra.mxu1 %v3043_v32 }
  0x88   : > { %2664 = vmatprep.subr.bf16.mxu0 %v3178_v0  ;;  %2676 = vmatprep.subr.bf16.mxu1 %v3178_v0 }
  0x89   : > { %2670 = vmatprep.mubr.msk.bf16.mxu0 %vm3179_vm0, %v3178_v0  ;;  %2682 = vmatprep.mubr.msk.bf16.mxu1 %vm3179_vm0, %v3178_v0 }
  0x8b   : > { %2665 = vmatpush3.bf16.msra.mxu0 %v3044_v34  ;;  %2677 = vmatpush3.bf16.msra.mxu1 %v3044_v34  ;;  %v3074_v34 = vld [vmem:[#allocation2 + $0x100] sm:$0xff]  }
  0x8c   : > { %2666 = vmatprep.subr.bf16.mxu0 %v3178_v0  ;;  %2678 = vmatprep.subr.bf16.mxu1 %v3178_v0 }
  0x8f   : > { %2667 = vmatpush3.bf16.msra.mxu0 %v3045_v35  ;;  %2679 = vmatpush3.bf16.msra.mxu1 %v3045_v35  ;;  %v3075_v35 = vld [vmem:[#allocation2 + $0x108] sm:$0xff]  }
  0x90   : > { %2668 = vmatprep.subr.bf16.mxu0 %v3178_v0  ;;  %2680 = vmatprep.subr.bf16.mxu1 %v3178_v0 }
  0x93   : > { %2669 = vmatpush3.bf16.msra.mxu0 %v3046_v37  ;;  %2681 = vmatpush3.bf16.msra.mxu1 %v3046_v37 }
  0x94   : > { %2686 = vmatprep.subr.bf16.mxu0 %v3178_v0  ;;  %2698 = vmatprep.subr.bf16.mxu1 %v3178_v0 }
  0x96   : > { %2671 = vmatmul.mubr.msk.bf16.vlgmr.msra.gmra.mrb[20].mxu0 %vm244_vm1, %v3458_v43  ;;  %2683 = vmatmul.mubr.msk.bf16.vlgmr.msra.gmra.mrb[20].mxu1 %vm244_vm1, %v3460_v44 }
  0x97   : > { %2687 = vmatpush3.bf16.msra.mxu0 %v3051_v45  ;;  %2699 = vmatpush3.bf16.msra.mxu1 %v3051_v45 }
  0x98   : > { %2688 = vmatprep.subr.bf16.mxu0 %v3178_v0  ;;  %2700 = vmatprep.subr.bf16.mxu1 %v3178_v0 }
  0x99   : > { %2694 = vmatprep.mubr.msk.bf16.mxu0 %vm3179_vm0, %v3178_v0  ;;  %2706 = vmatprep.mubr.msk.bf16.mxu1 %vm3179_vm0, %v3178_v0 }
  0x9b   : > { %2689 = vmatpush3.bf16.msra.mxu0 %v3052_v46  ;;  %2701 = vmatpush3.bf16.msra.mxu1 %v3052_v46 }
  0x9c   : > { %2690 = vmatprep.subr.bf16.mxu0 %v3178_v0  ;;  %2702 = vmatprep.subr.bf16.mxu1 %v3178_v0 }
  0x9f   : > { %2691 = vmatpush3.bf16.msra.mxu0 %v3053_v47  ;;  %2703 = vmatpush3.bf16.msra.mxu1 %v3053_v47 }
  0xa0   : > { %2692 = vmatprep.subr.bf16.mxu0 %v3178_v0  ;;  %2704 = vmatprep.subr.bf16.mxu1 %v3178_v0 }
  0xa3   : > { %2693 = vmatpush3.bf16.msra.mxu0 %v3054_v48  ;;  %2705 = vmatpush3.bf16.msra.mxu1 %v3054_v48 }
  0xa4   : > { %2710 = vmatprep.subr.bf16.mxu0 %v3178_v0  ;;  %2722 = vmatprep.subr.bf16.mxu1 %v3178_v0 }
  0xa6   : > { %2695 = vmatmul.mubr.msk.bf16.vlgmr.msra.gmra.mrb[24].mxu0 %vm244_vm1, %v3355_v20  ;;  %2707 = vmatmul.mubr.msk.bf16.vlgmr.msra.gmra.mrb[24].mxu1 %vm244_vm1, %v3387_v26  ;;  %v3073_v20 = vld [vmem:[%s3309_s26 + $0x14] ss:$0 sps:$4 sm:$0x77]  }
  0xa7   : > { %2711 = vmatpush3.bf16.msra.mxu0 %v3051_v45  ;;  %2723 = vmatpush3.bf16.msra.mxu1 %v3051_v45  ;;  %v1858_v27 = vshll.u32 %v3073_v20, 16 }
  0xa8   : > { %2712 = vmatprep.subr.bf16.mxu0 %v3178_v0  ;;  %2724 = vmatprep.subr.bf16.mxu1 %v3178_v0 }
  0xa9   : > { %2718 = vmatprep.mubr.msk.bf16.mxu0 %vm3179_vm0, %v3178_v0  ;;  %2730 = vmatprep.mubr.msk.bf16.mxu1 %vm3179_vm0, %v3178_v0  ;;  %v1860_v32 = vrot.slane %v1858_v27, 1 }
  0xab   : > { %2713 = vmatpush3.bf16.msra.mxu0 %v3052_v46  ;;  %2725 = vmatpush3.bf16.msra.mxu1 %v3052_v46 }
  0xac   : > { %2714 = vmatprep.subr.bf16.mxu0 %v3178_v0  ;;  %2726 = vmatprep.subr.bf16.mxu1 %v3178_v0 }
  0xaf   : > { %2715 = vmatpush3.bf16.msra.mxu0 %v3053_v47  ;;  %2727 = vmatpush3.bf16.msra.mxu1 %v3053_v47 }
  0xb0   : > { %2716 = vmatprep.subr.bf16.mxu0 %v3178_v0  ;;  %2728 = vmatprep.subr.bf16.mxu1 %v3178_v0 }
  0xb3   : > { %2717 = vmatpush3.bf16.msra.mxu0 %v3054_v48  ;;  %2729 = vmatpush3.bf16.msra.mxu1 %v3054_v48  ;;  %v3077_v48 = vld [vmem:[#allocation2 + $0x118] sm:$0xff]  }
  0xb4   : > { %2734 = vmatprep.subr.bf16.mxu0 %v3178_v0  ;;  %2746 = vmatprep.subr.bf16.mxu1 %v3178_v0 }
  0xb6   : > { %2719 = vmatmul.mubr.msk.bf16.vlgmr.msra.gmra.mrb[28].mxu0 %vm244_vm1, %v3417_v33  ;;  %2731 = vmatmul.mubr.msk.bf16.vlgmr.msra.gmra.mrb[28].mxu1 %vm244_vm1, %v3495_v50 }
  0xb7   : > { %2735 = vmatpush3.bf16.msra.mxu0 %v3055_v49  ;;  %2747 = vmatpush3.bf16.msra.mxu1 %v3055_v49 }
  0xb8   : > { %2736 = vmatprep.subr.bf16.mxu0 %v3178_v0  ;;  %2748 = vmatprep.subr.bf16.mxu1 %v3178_v0 }
  0xb9   : > { %2742 = vmatprep.mubr.msk.bf16.mxu0 %vm3179_vm0, %v3178_v0  ;;  %2754 = vmatprep.mubr.msk.bf16.mxu1 %vm3179_vm0, %v3178_v0 }
  0xbb   : > { %2737 = vmatpush3.bf16.msra.mxu0 %v3056_v51  ;;  %2749 = vmatpush3.bf16.msra.mxu1 %v3056_v51 }
  0xbc   : > { %2738 = vmatprep.subr.bf16.mxu0 %v3178_v0  ;;  %2750 = vmatprep.subr.bf16.mxu1 %v3178_v0 }
  0xbf   : > { %2739 = vmatpush3.bf16.msra.mxu0 %v3057_v52  ;;  %2751 = vmatpush3.bf16.msra.mxu1 %v3057_v52 }
  0xc0   : > { %2740 = vmatprep.subr.bf16.mxu0 %v3178_v0  ;;  %2752 = vmatprep.subr.bf16.mxu1 %v3178_v0 }
  0xc3   : > { %2741 = vmatpush3.bf16.msra.mxu0 %v3058_v53  ;;  %2753 = vmatpush3.bf16.msra.mxu1 %v3058_v53 }
  0xc4   : > { %2758 = vmatprep.subr.bf16.mxu0 %v3178_v0  ;;  %2770 = vmatprep.subr.bf16.mxu1 %v3178_v0 }
  0xc6   : > { %2743 = vmatmul.mubr.msk.bf16.vlgmr.msra.gmra.mrb[32].mxu0 %vm244_vm1, %v3352_v19  ;;  %2755 = vmatmul.mubr.msk.bf16.vlgmr.msra.gmra.mrb[32].mxu1 %vm244_vm1, %v3382_v25  ;;  %v3072_v19 = vld [vmem:[#allocation2 + $0xf8] sm:$0xff]  }
  0xc7   : > { %2759 = vmatpush3.bf16.msra.mxu0 %v3055_v49  ;;  %2771 = vmatpush3.bf16.msra.mxu1 %v3055_v49 }
  0xc8   : > { %2760 = vmatprep.subr.bf16.mxu0 %v3178_v0  ;;  %2772 = vmatprep.subr.bf16.mxu1 %v3178_v0 }
  0xc9   : > { %2766 = vmatprep.mubr.msk.bf16.mxu0 %vm3179_vm0, %v3178_v0  ;;  %2778 = vmatprep.mubr.msk.bf16.mxu1 %vm3179_vm0, %v3178_v0 }
  0xcb   : > { %2761 = vmatpush3.bf16.msra.mxu0 %v3056_v51  ;;  %2773 = vmatpush3.bf16.msra.mxu1 %v3056_v51 }
  0xcc   : > { %2762 = vmatprep.subr.bf16.mxu0 %v3178_v0  ;;  %2774 = vmatprep.subr.bf16.mxu1 %v3178_v0 }
  0xcf   : > { %2763 = vmatpush3.bf16.msra.mxu0 %v3057_v52  ;;  %2775 = vmatpush3.bf16.msra.mxu1 %v3057_v52 }
  0xd0   : > { %2764 = vmatprep.subr.bf16.mxu0 %v3178_v0  ;;  %2776 = vmatprep.subr.bf16.mxu1 %v3178_v0 }
  0xd3   : > { %2765 = vmatpush3.bf16.msra.mxu0 %v3058_v53  ;;  %2777 = vmatpush3.bf16.msra.mxu1 %v3058_v53 }
  0xd4   : > { %2782 = vmatprep.subr.bf16.mxu0 %v3178_v0  ;;  %2794 = vmatprep.subr.bf16.mxu1 %v3178_v0 }
  0xd6   : > { %2767 = vmatmul.mubr.msk.bf16.vlgmr.msra.gmra.mrb[36].mxu0 %vm244_vm1, %v3412_v31  ;;  %2779 = vmatmul.mubr.msk.bf16.vlgmr.msra.gmra.mrb[36].mxu1 %vm244_vm1, %v3530_v58 }
  0xd7   : > { %2783 = vmatpush3.bf16.msra.mxu0 %v3060_v59  ;;  %2795 = vmatpush3.bf16.msra.mxu1 %v3060_v59 }
  0xd8   : > { %2784 = vmatprep.subr.bf16.mxu0 %v3178_v0  ;;  %2796 = vmatprep.subr.bf16.mxu1 %v3178_v0 }
  0xd9   : > { %2790 = vmatprep.mubr.msk.bf16.mxu0 %vm3179_vm0, %v3178_v0  ;;  %2802 = vmatprep.mubr.msk.bf16.mxu1 %vm3179_vm0, %v3178_v0 }
  0xdb   : > { %2785 = vmatpush3.bf16.msra.mxu0 %v3061_v60  ;;  %2797 = vmatpush3.bf16.msra.mxu1 %v3061_v60 }
  0xdc   : > { %2786 = vmatprep.subr.bf16.mxu0 %v3178_v0  ;;  %2798 = vmatprep.subr.bf16.mxu1 %v3178_v0 }
  0xdf   : > { %2787 = vmatpush3.bf16.msra.mxu0 %v3062_v61  ;;  %2799 = vmatpush3.bf16.msra.mxu1 %v3062_v61 }
  0xe0   : > { %2788 = vmatprep.subr.bf16.mxu0 %v3178_v0  ;;  %2800 = vmatprep.subr.bf16.mxu1 %v3178_v0 }
  0xe3   : > { %2789 = vmatpush3.bf16.msra.mxu0 %v3063_v62  ;;  %2801 = vmatpush3.bf16.msra.mxu1 %v3063_v62 }
  0xe4   : > { %2806 = vmatprep.subr.bf16.mxu0 %v3178_v0  ;;  %2818 = vmatprep.subr.bf16.mxu1 %v3178_v0 }
  0xe6   : > { %2791 = vmatmul.mubr.msk.bf16.vlgmr.msra.gmra.mrb[40].mxu0 %vm244_vm1, %v732_v40  ;;  %2803 = vmatmul.mubr.msk.bf16.vlgmr.msra.gmra.mrb[40].mxu1 %vm244_vm1, %v3458_v43 }
  0xe7   : > { %2807 = vmatpush3.bf16.msra.mxu0 %v3060_v59  ;;  %2819 = vmatpush3.bf16.msra.mxu1 %v3060_v59 }
  0xe8   : > { %2808 = vmatprep.subr.bf16.mxu0 %v3178_v0  ;;  %2820 = vmatprep.subr.bf16.mxu1 %v3178_v0 }
  0xe9   : > { %2814 = vmatprep.mubr.msk.bf16.mxu0 %vm3179_vm0, %v3178_v0  ;;  %2826 = vmatprep.mubr.msk.bf16.mxu1 %vm3179_vm0, %v3178_v0 }
  0xeb   : > { %2809 = vmatpush3.bf16.msra.mxu0 %v3061_v60  ;;  %2821 = vmatpush3.bf16.msra.mxu1 %v3061_v60 }
  0xec   : > { %2810 = vmatprep.subr.bf16.mxu0 %v3178_v0  ;;  %2822 = vmatprep.subr.bf16.mxu1 %v3178_v0 }
  0xef   : > { %2811 = vmatpush3.bf16.msra.mxu0 %v3062_v61  ;;  %2823 = vmatpush3.bf16.msra.mxu1 %v3062_v61 }
  0xf0   : > { %2812 = vmatprep.subr.bf16.mxu0 %v3178_v0  ;;  %2824 = vmatprep.subr.bf16.mxu1 %v3178_v0 }
  0xf3   : > { %2813 = vmatpush3.bf16.msra.mxu0 %v3063_v62  ;;  %2825 = vmatpush3.bf16.msra.mxu1 %v3063_v62 }
  0xf4   : > { %2830 = vmatprep.subr.bf16.mxu0 %v3178_v0  ;;  %2842 = vmatprep.subr.bf16.mxu1 %v3178_v0 }
  0xf6   : > { %2815 = vmatmul.mubr.msk.bf16.vlgmr.msra.gmra.mrb[44].mxu0 %vm244_vm1, %v3460_v44  ;;  %2827 = vmatmul.mubr.msk.bf16.vlgmr.msra.gmra.mrb[44].mxu1 %vm244_vm1, %v1448_v1 }
  0xf7   : > { %2831 = vmatpush3.bf16.msra.mxu0 %v3065_v2  ;;  %2843 = vmatpush3.bf16.msra.mxu1 %v3065_v2 }
  0xf8   : > { %2832 = vmatprep.subr.bf16.mxu0 %v3178_v0  ;;  %2844 = vmatprep.subr.bf16.mxu1 %v3178_v0 }
  0xf9   : > { %2838 = vmatprep.mubr.msk.bf16.mxu0 %vm3179_vm0, %v3178_v0  ;;  %2850 = vmatprep.mubr.msk.bf16.mxu1 %vm3179_vm0, %v3178_v0 }
  0xfb   : > { %2833 = vmatpush3.bf16.msra.mxu0 %v3066_v3  ;;  %2845 = vmatpush3.bf16.msra.mxu1 %v3066_v3 }
  0xfc   : > { %2834 = vmatprep.subr.bf16.mxu0 %v3178_v0  ;;  %2846 = vmatprep.subr.bf16.mxu1 %v3178_v0 }
  0xff   : > { %2835 = vmatpush3.bf16.msra.mxu0 %v3067_v4  ;;  %2847 = vmatpush3.bf16.msra.mxu1 %v3067_v4 }
 0x100   : > { %2836 = vmatprep.subr.bf16.mxu0 %v3178_v0  ;;  %2848 = vmatprep.subr.bf16.mxu1 %v3178_v0 }
 0x103   : > { %2837 = vmatpush3.bf16.msra.mxu0 %v3068_v5  ;;  %2849 = vmatpush3.bf16.msra.mxu1 %v3068_v5 }
 0x104   : > { %2854 = vmatprep.subr.bf16.mxu0 %v3178_v0  ;;  %2866 = vmatprep.subr.bf16.mxu1 %v3178_v0 }
 0x106   : > { %2839 = vmatmul.mubr.msk.bf16.vlgmr.msra.gmra.mrb[48].mxu0 %vm244_vm1, %v3387_v26  ;;  %2851 = vmatmul.mubr.msk.bf16.vlgmr.msra.gmra.mrb[48].mxu1 %vm244_vm1, %v3417_v33 }
 0x107   : > { %2855 = vmatpush3.bf16.msra.mxu0 %v3065_v2  ;;  %2867 = vmatpush3.bf16.msra.mxu1 %v3065_v2 }
 0x108   : > { %2856 = vmatprep.subr.bf16.mxu0 %v3178_v0  ;;  %2868 = vmatprep.subr.bf16.mxu1 %v3178_v0 }
 0x109   : > { %2862 = vmatprep.mubr.msk.bf16.mxu0 %vm3179_vm0, %v3178_v0  ;;  %2874 = vmatprep.mubr.msk.bf16.mxu1 %vm3179_vm0, %v3178_v0 }
 0x10b   : > { %2857 = vmatpush3.bf16.msra.mxu0 %v3066_v3  ;;  %2869 = vmatpush3.bf16.msra.mxu1 %v3066_v3 }
 0x10c   : > { %2858 = vmatprep.subr.bf16.mxu0 %v3178_v0  ;;  %2870 = vmatprep.subr.bf16.mxu1 %v3178_v0 }
 0x10f   : > { %2859 = vmatpush3.bf16.msra.mxu0 %v3067_v4  ;;  %2871 = vmatpush3.bf16.msra.mxu1 %v3067_v4 }
 0x110   : > { %2860 = vmatprep.subr.bf16.mxu0 %v3178_v0  ;;  %2872 = vmatprep.subr.bf16.mxu1 %v3178_v0 }
 0x113   : > { %2861 = vmatpush3.bf16.msra.mxu0 %v3068_v5  ;;  %2873 = vmatpush3.bf16.msra.mxu1 %v3068_v5 }
 0x114   : > { %2878 = vmatprep.subr.bf16.mxu0 %v3178_v0  ;;  %2890 = vmatprep.subr.bf16.mxu1 %v3178_v0 }
 0x116   : > { %2863 = vmatmul.mubr.msk.bf16.vlgmr.msra.gmra.mrb[52].mxu0 %vm244_vm1, %v3495_v50  ;;  %2875 = vmatmul.mubr.msk.bf16.vlgmr.msra.gmra.mrb[52].mxu1 %vm244_vm1, %v2327_v7 }
 0x117   : > { %2879 = vmatpush3.bf16.msra.mxu0 %v3069_v6  ;;  %2891 = vmatpush3.bf16.msra.mxu1 %v3069_v6 }
 0x118   : > { %2880 = vmatprep.subr.bf16.mxu0 %v3178_v0  ;;  %2892 = vmatprep.subr.bf16.mxu1 %v3178_v0 }
 0x119   : > { %v282_v9 = vpop.f32.mrb[0].mxu0  ;;  %2886 = vmatprep.mubr.msk.bf16.mxu0 %vm3179_vm0, %v3178_v0  ;;  %v349_v10 = vpop.f32.mrb[0].mxu1  ;;  %2898 = vmatprep.mubr.msk.bf16.mxu1 %vm3179_vm0, %v3178_v0 }
 0x11a   : > { %v2552_v11 = vpop.f32.mrb[1].mxu0  ;;  %v3614_v12 = vadd.f32 %v349_v10, %v282_v9  ;;  %v2564_v13 = vpop.f32.mrb[1].mxu1 }
 0x11b   : > { %v285_v14 = vpop.f32.mrb[2].mxu0  ;;  %2881 = vmatpush3.bf16.msra.mxu0 %v3070_v8  ;;  %v352_v16 = vpop.f32.mrb[2].mxu1  ;;  %2893 = vmatpush3.bf16.msra.mxu1 %v3070_v8 }
 0x11c   : > { %v2553_v17 = vpop.f32.mrb[3].mxu0  ;;  %2882 = vmatprep.subr.bf16.mxu0 %v3178_v0  ;;  %v2565_v18 = vpop.f32.mrb[3].mxu1  ;;  %2894 = vmatprep.subr.bf16.mxu1 %v3178_v0 }
 0x11f   : > { %2883 = vmatpush3.bf16.msra.mxu0 %v3071_v15  ;;  %2895 = vmatpush3.bf16.msra.mxu1 %v3071_v15 }
 0x120   : > { %2884 = vmatprep.subr.bf16.mxu0 %v3178_v0  ;;  %2896 = vmatprep.subr.bf16.mxu1 %v3178_v0 }
 0x123   : > { %2885 = vmatpush3.bf16.msra.mxu0 %v3072_v19  ;;  %2897 = vmatpush3.bf16.msra.mxu1 %v3072_v19 }
 0x124   : > { %2902 = vmatprep.subr.bf16.mxu0 %v3178_v0  ;;  %2914 = vmatprep.subr.bf16.mxu1 %v3178_v0 }
 0x126   : > { %2887 = vmatmul.mubr.msk.bf16.vlgmr.msra.gmra.mrb[56].mxu0 %vm244_vm1, %v3382_v25  ;;  %2899 = vmatmul.mubr.msk.bf16.vlgmr.msra.gmra.mrb[56].mxu1 %vm244_vm1, %v3412_v31  ;;  %v1856_v31 = vshrl.u32 %v3073_v20, 16 }
 0x127   : > { %2903 = vmatpush3.bf16.msra.mxu0 %v3069_v6  ;;  %2915 = vmatpush3.bf16.msra.mxu1 %v3069_v6 }
 0x128   : > { %2904 = vmatprep.subr.bf16.mxu0 %v3178_v0  ;;  %2916 = vmatprep.subr.bf16.mxu1 %v3178_v0  ;;  %v1861_v33 = vor.u32 %v1860_v32, %v1856_v31 }
 0x129   : > { %v403_v21 = vpop.f32.mrb[4].mxu0  ;;  %2910 = vmatprep.mubr.msk.bf16.mxu0 %vm3179_vm0, %v3178_v0  ;;  %v446_v22 = vpop.f32.mrb[4].mxu1  ;;  %2922 = vmatprep.mubr.msk.bf16.mxu1 %vm3179_vm0, %v3178_v0 }
 0x12a   : > { %v2576_v23 = vpop.f32.mrb[5].mxu0  ;;  %v3633_v24 = vadd.f32 %v446_v22, %v403_v21  ;;  %v2588_v25 = vpop.f32.mrb[5].mxu1 }
 0x12b   : > { %v406_v26 = vpop.f32.mrb[6].mxu0  ;;  %2905 = vmatpush3.bf16.msra.mxu0 %v3070_v8  ;;  %v449_v28 = vpop.f32.mrb[6].mxu1  ;;  %2917 = vmatpush3.bf16.msra.mxu1 %v3070_v8 }
 0x12c   : > { %v2577_v29 = vpop.f32.mrb[7].mxu0  ;;  %2906 = vmatprep.subr.bf16.mxu0 %v3178_v0  ;;  %v2589_v30 = vpop.f32.mrb[7].mxu1  ;;  %2918 = vmatprep.subr.bf16.mxu1 %v3178_v0 }
 0x12f   : > { %2907 = vmatpush3.bf16.msra.mxu0 %v3071_v15  ;;  %2919 = vmatpush3.bf16.msra.mxu1 %v3071_v15 }
 0x130   : > { %2908 = vmatprep.subr.bf16.mxu0 %v3178_v0  ;;  %2920 = vmatprep.subr.bf16.mxu1 %v3178_v0 }
 0x133   : > { %2909 = vmatpush3.bf16.msra.mxu0 %v3072_v19  ;;  %2921 = vmatpush3.bf16.msra.mxu1 %v3072_v19 }
 0x134   : > { %2926 = vmatprep.subr.bf16.mxu0 %v3178_v0  ;;  %2938 = vmatprep.subr.bf16.mxu1 %v3178_v0 }
 0x136   : > { %2911 = vmatmul.mubr.msk.bf16.vlgmr.msra.gmra.mrb[60].mxu0 %vm244_vm1, %v3530_v58  ;;  %2923 = vmatmul.mubr.msk.bf16.vlgmr.msra.gmra.mrb[60].mxu1 %vm244_vm1, %v1861_v33 }
 0x137   : > { %2927 = vmatpush3.bf16.msra.mxu0 %v3074_v34  ;;  %2939 = vmatpush3.bf16.msra.mxu1 %v3074_v34 }
 0x138   : > { %2928 = vmatprep.subr.bf16.mxu0 %v3178_v0  ;;  %2940 = vmatprep.subr.bf16.mxu1 %v3178_v0 }
 0x139   : > { %v500_v36 = vpop.f32.mrb[8].mxu0  ;;  %2934 = vmatprep.mubr.msk.bf16.mxu0 %vm3179_vm0, %v3178_v0  ;;  %v543_v37 = vpop.f32.mrb[8].mxu1  ;;  %2946 = vmatprep.mubr.msk.bf16.mxu1 %vm3179_vm0, %v3178_v0 }
 0x13a   : > { %v2600_v38 = vpop.f32.mrb[9].mxu0  ;;  %v544_v39 = vadd.f32 %v543_v37, %v500_v36  ;;  %v2612_v40 = vpop.f32.mrb[9].mxu1 }
 0x13b   : > { %v503_v41 = vpop.f32.mrb[10].mxu0  ;;  %2929 = vmatpush3.bf16.msra.mxu0 %v3075_v35  ;;  %v546_v45 = vpop.f32.mrb[10].mxu1  ;;  %2941 = vmatpush3.bf16.msra.mxu1 %v3075_v35 }
 0x13c   : > { %v2601_v46 = vpop.f32.mrb[11].mxu0  ;;  %2930 = vmatprep.subr.bf16.mxu0 %v3178_v0  ;;  %v2613_v47 = vpop.f32.mrb[11].mxu1  ;;  %2942 = vmatprep.subr.bf16.mxu1 %v3178_v0 }
 0x13f   : > { %2931 = vmatpush3.bf16.msra.mxu0 %v3076_v42  ;;  %2943 = vmatpush3.bf16.msra.mxu1 %v3076_v42 }
 0x140   : > { %2932 = vmatprep.subr.bf16.mxu0 %v3178_v0  ;;  %2944 = vmatprep.subr.bf16.mxu1 %v3178_v0 }
 0x143   : > { %2933 = vmatpush3.bf16.msra.mxu0 %v3077_v48  ;;  %2945 = vmatpush3.bf16.msra.mxu1 %v3077_v48 }
 0x144   : > { %2950 = vmatprep.subr.bf16.mxu0 %v3178_v0  ;;  %2962 = vmatprep.subr.bf16.mxu1 %v3178_v0 }
 0x146   : > { %2935 = vmatmul.mubr.msk.bf16.vlgmr.msra.gmra.mrb[64].mxu0 %vm244_vm1, %v3458_v43  ;;  %2947 = vmatmul.mubr.msk.bf16.vlgmr.msra.gmra.mrb[64].mxu1 %vm244_vm1, %v3460_v44 }
 0x147   : > { %2951 = vmatpush3.bf16.msra.mxu0 %v3074_v34  ;;  %2963 = vmatpush3.bf16.msra.mxu1 %v3074_v34 }
 0x148   : > { %2952 = vmatprep.subr.bf16.mxu0 %v3178_v0  ;;  %2964 = vmatprep.subr.bf16.mxu1 %v3178_v0 }
 0x149   : > { %v597_v49 = vpop.f32.mrb[12].mxu0  ;;  %2958 = vmatprep.mubr.msk.bf16.mxu0 %vm3179_vm0, %v3178_v0  ;;  %v640_v50 = vpop.f32.mrb[12].mxu1  ;;  %2970 = vmatprep.mubr.msk.bf16.mxu1 %vm3179_vm0, %v3178_v0 }
 0x14a   : > { %v2624_v51 = vpop.f32.mrb[13].mxu0  ;;  %v641_v43 = vadd.f32 %v640_v50, %v597_v49  ;;  %v2636_v52 = vpop.f32.mrb[13].mxu1 }
 0x14b   : > { %v600_v53 = vpop.f32.mrb[14].mxu0  ;;  %2953 = vmatpush3.bf16.msra.mxu0 %v3075_v35  ;;  %v643_v44 = vpop.f32.mrb[14].mxu1  ;;  %2965 = vmatpush3.bf16.msra.mxu1 %v3075_v35 }
 0x14c   : > { %v2625_v54 = vpop.f32.mrb[15].mxu0  ;;  %2954 = vmatprep.subr.bf16.mxu0 %v3178_v0  ;;  %v2637_v55 = vpop.f32.mrb[15].mxu1  ;;  %2966 = vmatprep.subr.bf16.mxu1 %v3178_v0 }
 0x14f   : > { %2955 = vmatpush3.bf16.msra.mxu0 %v3076_v42  ;;  %2967 = vmatpush3.bf16.msra.mxu1 %v3076_v42 }
 0x150   : > { %2956 = vmatprep.subr.bf16.mxu0 %v3178_v0  ;;  %2968 = vmatprep.subr.bf16.mxu1 %v3178_v0 }
 0x153   : > { %2957 = vmatpush3.bf16.msra.mxu0 %v3077_v48  ;;  %2969 = vmatpush3.bf16.msra.mxu1 %v3077_v48 }
 0x156   : > { %2959 = vmatmul.mubr.msk.bf16.vlgmr.msra.gmra.mrb[68].mxu0 %vm244_vm1, %v1448_v1  ;;  %2971 = vmatmul.mubr.msk.bf16.vlgmr.msra.gmra.mrb[68].mxu1 %vm244_vm1, %v2066_v57 }
 0x159   : > { %v721_v58 = vpop.f32.mrb[16].mxu0  ;;  %v770_v60 = vpop.f32.mrb[16].mxu1 }
 0x15a   : > { %v727_v59 = vadd.f32 %v721_v58, %v3614_v12  ;;  %v2648_v61 = vpop.f32.mrb[17].mxu0  ;;  %v776_v62 = vadd.f32 %v770_v60, %v3633_v24  ;;  %v2660_v2 = vpop.f32.mrb[17].mxu1 }
 0x15b   : > { %v724_v3 = vpop.f32.mrb[18].mxu0  ;;  %v773_v4 = vpop.f32.mrb[18].mxu1 }
 0x15c   : > { %v2649_v0 = vpop.f32.mrb[19].mxu0  ;;  %v2661_v5 = vpop.f32.mrb[19].mxu1 }
 0x169   : > { %v819_v6 = vpop.f32.mrb[20].mxu0  ;;  %v868_v8 = vpop.f32.mrb[20].mxu1 }
 0x16a   : > { %v825_v7 = vadd.f32 %v819_v6, %v544_v39  ;;  %v2672_v63 = vpop.f32.mrb[21].mxu0  ;;  %v874_v9 = vadd.f32 %v868_v8, %v641_v43  ;;  %v2684_v1 = vpop.f32.mrb[21].mxu1 }
 0x16b   : > { %v822_v10 = vpop.f32.mrb[22].mxu0  ;;  %v871_v11 = vpop.f32.mrb[22].mxu1 }
 0x16c   : > { %v2673_v13 = vpop.f32.mrb[23].mxu0  ;;  %v2685_v14 = vpop.f32.mrb[23].mxu1 }
 0x179   : > { %v942_v12 = vpop.f32.mrb[24].mxu0  ;;  %v983_v16 = vpop.f32.mrb[24].mxu1 }
 0x17a   : > { %v948_v15 = vadd.f32 %v942_v12, %v727_v59  ;;  %v2696_v17 = vpop.f32.mrb[25].mxu0  ;;  %v989_v18 = vadd.f32 %v983_v16, %v776_v62  ;;  %v2708_v19 = vpop.f32.mrb[25].mxu1 }
 0x17b   : > { %v945_v20 = vpop.f32.mrb[26].mxu0  ;;  %v986_v21 = vpop.f32.mrb[26].mxu1 }
 0x17c   : > { %v2697_v22 = vpop.f32.mrb[27].mxu0  ;;  %v2709_v23 = vpop.f32.mrb[27].mxu1 }
 0x189   : > { %v1024_v24 = vpop.f32.mrb[28].mxu0  ;;  %v1070_v26 = vpop.f32.mrb[28].mxu1 }
 0x18a   : > { %v1030_v25 = vadd.f32 %v1024_v24, %v825_v7  ;;  %v2720_v27 = vpop.f32.mrb[29].mxu0  ;;  %v1076_v28 = vadd.f32 %v1070_v26, %v874_v9  ;;  %v2732_v29 = vpop.f32.mrb[29].mxu1 }
 0x18b   : > { %v1027_v30 = vpop.f32.mrb[30].mxu0  ;;  %v1073_v31 = vpop.f32.mrb[30].mxu1 }
 0x18c   : > { %v2721_v32 = vpop.f32.mrb[31].mxu0  ;;  %v2733_v33 = vpop.f32.mrb[31].mxu1 }
 0x199   : > { %v1144_v34 = vpop.f32.mrb[32].mxu0  ;;  %v1185_v36 = vpop.f32.mrb[32].mxu1 }
 0x19a   : > { %v1150_v35 = vadd.f32 %v1144_v34, %v948_v15  ;;  %v2744_v37 = vpop.f32.mrb[33].mxu0  ;;  %v1191_v38 = vadd.f32 %v1185_v36, %v989_v18  ;;  %v2756_v39 = vpop.f32.mrb[33].mxu1 }
 0x19b   : > { %v1147_v40 = vpop.f32.mrb[34].mxu0  ;;  %v1188_v41 = vpop.f32.mrb[34].mxu1 }
 0x19c   : > { %v2745_v42 = vpop.f32.mrb[35].mxu0  ;;  %v2757_v45 = vpop.f32.mrb[35].mxu1 }
 0x1a9   : > { %v1226_v46 = vpop.f32.mrb[36].mxu0  ;;  %v1281_v48 = vpop.f32.mrb[36].mxu1 }
 0x1aa   : > { %v1232_v47 = vadd.f32 %v1226_v46, %v1030_v25  ;;  %v2768_v49 = vpop.f32.mrb[37].mxu0  ;;  %v1287_v50 = vadd.f32 %v1281_v48, %v1076_v28  ;;  %v2780_v51 = vpop.f32.mrb[37].mxu1 }
 0x1ab   : > { %v1229_v43 = vpop.f32.mrb[38].mxu0  ;;  %v1284_v52 = vpop.f32.mrb[38].mxu1 }
 0x1ac   : > { %v2769_v53 = vpop.f32.mrb[39].mxu0  ;;  %v2781_v44 = vpop.f32.mrb[39].mxu1  ;;  %v2349_v52 = vld [vmem:[%s3736_s2] ss:$0 sm:$0xff] }
 0x1b9   : > { %v1355_v54 = vpop.f32.mrb[40].mxu0  ;;  %v1396_v56 = vpop.f32.mrb[40].mxu1 }
 0x1ba   : > { %v1361_v55 = vadd.f32 %v1355_v54, %v1150_v35  ;;  %v2792_v57 = vpop.f32.mrb[41].mxu0  ;;  %v1402_v58 = vadd.f32 %v1396_v56, %v1191_v38  ;;  %v2804_v59 = vpop.f32.mrb[41].mxu1 }
 0x1bb   : > { %v1358_v60 = vpop.f32.mrb[42].mxu0  ;;  %v1399_v61 = vpop.f32.mrb[42].mxu1 }
 0x1bc   : > { %v2793_v62 = vpop.f32.mrb[43].mxu0  ;;  %v2805_v2 = vpop.f32.mrb[43].mxu1 }
 0x1c9   : > { %v1437_v3 = vpop.f32.mrb[44].mxu0  ;;  %v1486_v0 = vpop.f32.mrb[44].mxu1 }
 0x1ca   : > { %v1443_v4 = vadd.f32 %v1437_v3, %v1232_v47  ;;  %v2816_v5 = vpop.f32.mrb[45].mxu0  ;;  %v1492_v6 = vadd.f32 %v1486_v0, %v1287_v50  ;;  %v2828_v7 = vpop.f32.mrb[45].mxu1 }
 0x1cb   : > { %v1440_v8 = vpop.f32.mrb[46].mxu0  ;;  %v1489_v63 = vpop.f32.mrb[46].mxu1 }
 0x1cc   : > { %v2817_v9 = vpop.f32.mrb[47].mxu0  ;;  %v2829_v1 = vpop.f32.mrb[47].mxu1 }
 0x1d9   : > { %v1560_v10 = vpop.f32.mrb[48].mxu0  ;;  %v1601_v13 = vpop.f32.mrb[48].mxu1 }
 0x1da   : > { %v1566_v11 = vadd.f32 %v1560_v10, %v1361_v55  ;;  %v2840_v14 = vpop.f32.mrb[49].mxu0  ;;  %v1607_v12 = vadd.f32 %v1601_v13, %v1402_v58  ;;  %v2852_v15 = vpop.f32.mrb[49].mxu1 }
 0x1db   : > { %v1563_v16 = vpop.f32.mrb[50].mxu0  ;;  %v1604_v17 = vpop.f32.mrb[50].mxu1 }
 0x1dc   : > { %v2841_v18 = vpop.f32.mrb[51].mxu0  ;;  %v2853_v19 = vpop.f32.mrb[51].mxu1 }
 0x1e9   : > { %v1642_v20 = vpop.f32.mrb[52].mxu0  ;;  %v1688_v22 = vpop.f32.mrb[52].mxu1 }
 0x1ea   : > { %v1648_v21 = vadd.f32 %v1642_v20, %v1443_v4  ;;  %v2864_v23 = vpop.f32.mrb[53].mxu0  ;;  %v1694_v24 = vadd.f32 %v1688_v22, %v1492_v6  ;;  %v2876_v25 = vpop.f32.mrb[53].mxu1 }
 0x1eb   : > { %v1645_v26 = vpop.f32.mrb[54].mxu0  ;;  %v1691_v27 = vpop.f32.mrb[54].mxu1 }
 0x1ec   : > { %v2865_v28 = vpop.f32.mrb[55].mxu0  ;;  %v2877_v29 = vpop.f32.mrb[55].mxu1 }
 0x1f9   : > { %v1762_v30 = vpop.f32.mrb[56].mxu0  ;;  %v1803_v32 = vpop.f32.mrb[56].mxu1 }
 0x1fa   : > { %v1768_v31 = vadd.f32 %v1762_v30, %v1566_v11  ;;  %v2888_v33 = vpop.f32.mrb[57].mxu0  ;;  %v1809_v34 = vadd.f32 %v1803_v32, %v1607_v12  ;;  %v2900_v35 = vpop.f32.mrb[57].mxu1 }
 0x1fb   : > { %v1765_v36 = vpop.f32.mrb[58].mxu0  ;;  %v1806_v37 = vpop.f32.mrb[58].mxu1 }
 0x1fc   : > { %v2889_v38 = vpop.f32.mrb[59].mxu0  ;;  %v2901_v39 = vpop.f32.mrb[59].mxu1 }
 0x209   : > { %v1844_v40 = vpop.f32.mrb[60].mxu0  ;;  %v1899_v42 = vpop.f32.mrb[60].mxu1 }
 0x20a   : > { %v1850_v41 = vadd.f32 %v1844_v40, %v1648_v21  ;;  %v2912_v45 = vpop.f32.mrb[61].mxu0  ;;  %v1905_v46 = vadd.f32 %v1899_v42, %v1694_v24  ;;  %v2924_v47 = vpop.f32.mrb[61].mxu1 }
 0x20b   : > { %v1847_v48 = vpop.f32.mrb[62].mxu0  ;;  %v1902_v49 = vpop.f32.mrb[62].mxu1 }
 0x20c   : > { %v2913_v50 = vpop.f32.mrb[63].mxu0  ;;  %v2925_v51 = vpop.f32.mrb[63].mxu1 }
 0x219   : > { %v1973_v43 = vpop.f32.mrb[64].mxu0  ;;  %v2014_v44 = vpop.f32.mrb[64].mxu1 }
 0x21a   : > { %v1979_v53 = vadd.f32 %v1973_v43, %v1768_v31  ;;  %v2936_v54 = vpop.f32.mrb[65].mxu0  ;;  %v2020_v55 = vadd.f32 %v2014_v44, %v1809_v34  ;;  %v2948_v56 = vpop.f32.mrb[65].mxu1 }
 0x21b   : > { %v1976_v57 = vpop.f32.mrb[66].mxu0  ;;  %v2017_v59 = vpop.f32.mrb[66].mxu1 }
 0x21c   : > { %v2118_v58 = vadd.f32 %v2349_v52, %v1979_v53  ;;  %v2937_v60 = vpop.f32.mrb[67].mxu0  ;;  %v2128_v61 = vadd.f32 %v2349_v52, %v2020_v55  ;;  %v2949_v62 = vpop.f32.mrb[67].mxu1 }
 0x21e   : > { %v2119_v2 = vpack.c.bf16 %v2118_v58, %v2118_v58  ;;  %v2129_v3 = vpack.c.bf16 %v2128_v61, %v2128_v61 }
 0x220   : > { %2120 = vst [vmem:[%s178_s4] sm:$0x3] %v2119_v2  ;;  %2351 = vst [vmem:[%s178_s4 + $0x2] sm:$0x3] %v2129_v3 }
 0x229   : > { %v2055_v4 = vpop.f32.mrb[68].mxu0  ;;  %v2104_v5 = vpop.f32.mrb[68].mxu1 }
 0x22a   : > { %v2061_v0 = vadd.f32 %v2055_v4, %v1850_v41  ;;  %v2960_v6 = vpop.f32.mrb[69].mxu0  ;;  %v2110_v7 = vadd.f32 %v2104_v5, %v1905_v46  ;;  %v2972_v8 = vpop.f32.mrb[69].mxu1 }
 0x22b   : > { %v2058_v63 = vpop.f32.mrb[70].mxu0  ;;  %v2107_v1 = vpop.f32.mrb[70].mxu1 }
 0x22c   : > { %v2139_v9 = vadd.f32 %v2349_v52, %v2061_v0  ;;  %v2961_v10 = vpop.f32.mrb[71].mxu0  ;;  %v2150_v11 = vadd.f32 %v2349_v52, %v2110_v7  ;;  %v2973_v13 = vpop.f32.mrb[71].mxu1 }
 0x22e   : > { %v2140_v14 = vpack.c.bf16 %v2139_v9, %v2139_v9  ;;  %v2151_v12 = vpack.c.bf16 %v2150_v11, %v2150_v11 }
 0x230   : > { %2353 = vst [vmem:[%s178_s4 + $0x4] sm:$0x3] %v2140_v14  ;;  %2355 = vst [vmem:[%s178_s4 + $0x6] sm:$0x3] %v2151_v12 }
 0x231   : > { %3120 = shalt.err (!%p3117_p7)
}
 0x232   : > { %s3121_s20 = scalar_lea.hbm %s3689_s9, 128  ;;  %s3125_s26 = scalar_lea.hbm %s3737_s3, 256 }
 0x233   : > { %p3122_p8 = scmp.ne.s32.totalorder %s3689_s9, %s3121_s20  ;;  %p3126_p1 = scmp.lt.u32.totalorder %s3689_s9, %s3737_s3 }
 0x234   : > { %p3127_p0 = scmp.lt.u32.totalorder %s3125_s26, %s3121_s20  ;;  %p3129_p6 = scmp.lt.u32.totalorder %s3121_s20, %s3689_s9 }
 0x235   : > { %p3123_p11 = pnand %p3122_p8, %p3748_p9 }
 0x236   : > { %p3128_p5 = por %p3127_p0, %p3126_p1 }
 0x237   : > { %p3124_p13 = pneg %p3123_p11 }
 0x238   : > { %p3130_p10 = por %p3129_p6, %p3128_p5 }
 0x23a   : > { %p3131_p12 = pnand %p3130_p10, %p3124_p13 }
 0x23c   : > { %3134 = shalt.err (!%p3131_p12)
}
 0x23d   : > { %s3181_s29 = smov 32   ;;  %s3182_s30 = smov 2  }
 0x23e   : > { %2979 = dma.vmem_to_hbm [thread:$0]  (%p3748_p9), %s3684_s5, 128, %s3689_s9, %s3693_s16, %s3181_s29, %s3181_s29, %s3182_s30  }
 0x23f PF: > { %p2991_p2 = scmp.ge.s32.totalorder %s3173_s15, 2  ;;  %s2183_s4 = sand.u32 1, %s3161_s12  }
 0x240   : > { %p3749_p3 = scmp.ne.s32.totalorder %s3742_s23, 0  ;;  %s2184_s6 = scalar_lea.sflag [#allocation4], %s2183_s4 }
 0x242   : > { %p2986_p4 = pnand %p2991_p2, %p3749_p3 }
 0x244   : > { %3156 = dma.done.wait (!%p2986_p4), %s2184_s6, 128  }
 0x245   : > { %3158 = vsyncadd (!%p2986_p4), %s2184_s6, 4294967168  ;;  %p14_p7 = scmp.ge.s32.totalorder %s3228_s18, 4   ;;  %s3750_s12 = smov %s3165_s13 }
 0x246   : > { %s3751_s13 = smov %s3169_s14  ;;  %s3752_s14 = smov %s3239_s21 }
 0x247   : > { %s3753_s15 = smov %s3228_s18  ;;  %16 = sbr.rel (!%p14_p7) target bundleno = 4 (0x4), region = 88 }
 0x24e   :  { %2189 = vsyncpa [#allocation3], 1 }
 0x24f   :  { %2191 = vsyncpa [#allocation3 + $0x1], 1 }
 0x250   :  { %2192 = vsyncpa [#allocation4], 1 }
 0x251   :  { %2194 = vsyncpa [#allocation4 + $0x1], 1 }

</bundles_post_ra>
